<compile_context>
chip_gen: v7x
topology: tpu7x:2x2x1
jax: 0.10.0
libtpu: 0.0.40
codegen_flags: <defaults>
</compile_context>

<pallas_src>
import jax
import jax.numpy as jnp
from jax import lax
from jax.experimental import pallas as pl
from jax.experimental.pallas import tpu as pltpu


def _make_infersent_kernel(T, B, E, H, pool_type):
    """Kernel body for fixed static shapes; one program handles both directions."""
    G = 4 * H  # per-direction gate width

    def kernel(max_len_ref,                               # SMEM (1,) prefetch
               len_ref, x_ref, wih_ref, whh_ref, b_ref,   # inputs
               out_ref,                                   # (B, 2H) output
               gates_ref,                                 # VMEM (T*B, 8H) f32
               hf_ref, cf_ref, hb_ref, cb_ref,            # VMEM (B, H) state
               accf_ref, accb_ref):                       # VMEM (B, H) pools
        max_len = max_len_ref[0]                          # dynamic trip count
        lens = len_ref[...]                               # (B, 1) int32
        lens_bh = jnp.broadcast_to(lens, (B, H))          # hoisted broadcast

        # ---- hoisted input projection: one big matmul + bias for BOTH
        # directions (columns [0:4H] = fwd gates, [4H:8H] = bwd gates) ----
        gates_ref[...] = (
            jnp.dot(x_ref[...], wih_ref[...],
                    preferred_element_type=jnp.float32) + b_ref[...])

        whh_f = whh_ref[0]                                # (H, 4H) bf16
        whh_b = whh_ref[1]

        zeros = jnp.zeros((B, H), jnp.float32)
        hf_ref[...] = zeros
        cf_ref[...] = zeros
        hb_ref[...] = zeros
        cb_ref[...] = zeros
        if pool_type == 'max':
            acc0 = jnp.full((B, H), -jnp.inf, jnp.float32)
        else:
            acc0 = zeros
        accf_ref[...] = acc0
        accb_ref[...] = acc0

        def cell(g, c):
            # PyTorch gate order: i, f, g, o (H=128 keeps slices lane-aligned)
            i_g = jax.nn.sigmoid(g[:, 0 * H:1 * H])
            f_g = jax.nn.sigmoid(g[:, 1 * H:2 * H])
            g_g = jnp.tanh(g[:, 2 * H:3 * H])
            o_g = jax.nn.sigmoid(g[:, 3 * H:4 * H])
            c_new = f_g * c + i_g * g_g
            return o_g * jnp.tanh(c_new), c_new

        # Only max(sent_len) steps; both directions interleaved per step.
        @pl.loop(0, max_len)
        def _(i):
            t_f = i
            t_b = max_len - 1 - i
            row_f = pl.multiple_of(t_f * B, B)
            row_b = pl.multiple_of(t_b * B, B)

            h_f = hf_ref[...]
            c_f = cf_ref[...]
            h_b = hb_ref[...]
            c_b = cb_ref[...]

            # Two INDEPENDENT recurrence matmuls -> their MXU/EUP chains
            # overlap on single-TC chips.
            g_f = gates_ref[pl.ds(row_f, B), pl.ds(0, G)] + jnp.dot(
                h_f.astype(jnp.bfloat16), whh_f,
                preferred_element_type=jnp.float32)
            g_b = gates_ref[pl.ds(row_b, B), pl.ds(G, G)] + jnp.dot(
                h_b.astype(jnp.bfloat16), whh_b,
                preferred_element_type=jnp.float32)

            hn_f, cn_f = cell(g_f, c_f)
            hn_b, cn_b = cell(g_b, c_b)

            valid_f = t_f < lens_bh                       # (B, H) bool
            valid_b = t_b < lens_bh
            # element-select (NOT arithmetic masking) so garbage from padded
            # embeddings can never leak NaN/inf into h/c/acc
            out_f = jnp.where(valid_f, hn_f, 0.0)
            out_b = jnp.where(valid_b, hn_b, 0.0)

            if pool_type == 'max':
                accf_ref[...] = jnp.maximum(accf_ref[...], out_f)
                accb_ref[...] = jnp.maximum(accb_ref[...], out_b)
            else:                                         # 'mean'
                accf_ref[...] = accf_ref[...] + out_f
                accb_ref[...] = accb_ref[...] + out_b

            # packed-sequence semantics: state frozen / stays zero past len
            hf_ref[...] = jnp.where(valid_f, hn_f, h_f)
            cf_ref[...] = jnp.where(valid_f, cn_f, c_f)
            hb_ref[...] = jnp.where(valid_b, hn_b, h_b)
            cb_ref[...] = jnp.where(valid_b, cn_b, c_b)

        # lane-dense (B, 2H) store: columns [0:H] fwd pool, [H:2H] bwd pool
        if pool_type == 'max':
            out_ref[:, pl.ds(0, H)] = accf_ref[...]
            out_ref[:, pl.ds(H, H)] = accb_ref[...]
        else:
            inv_len = pl.reciprocal(lens.astype(jnp.float32), approx=True)
            out_ref[:, pl.ds(0, H)] = accf_ref[...] * inv_len
            out_ref[:, pl.ds(H, H)] = accb_ref[...] * inv_len

    return kernel


def infersent_forward(sent, sent_len, params, pool_type='max'):
    """Pallas-backed equivalent of InferSent.forward((sent, sent_len))."""
    T, B, E = sent.shape
    H = params['whh_f'].shape[0]
    G = 4 * H

    # ---- pad batch to a multiple of 8 (sublane). For production throughput
    # the caller should batch >=128 (v5e) / >=256 (v6e/v7x) sentences so the
    # serial recurrence matmul fills the MXU rows. ----
    B_pad = max(8, ((B + 7) // 8) * 8)
    pad_b = B_pad - B
    # ---- pad E (projection contraction dim) to a multiple of 128 lanes ----
    E_pad = max(128, ((E + 127) // 128) * 128)
    pad_e = E_pad - E

    x = sent.astype(jnp.bfloat16)
    x = jnp.pad(x, ((0, 0), (0, pad_b), (0, pad_e)))
    x2d = x.reshape(T * B_pad, E_pad)                     # time-major rows

    lens = sent_len.astype(jnp.int32).reshape(B, 1)
    if pad_b:
        lens = jnp.pad(lens, ((0, pad_b), (0, 0)), constant_values=1)
    # clamp to [1, T]: guards the -inf max-pool init and the gates-scratch rows
    max_len = jnp.clip(jnp.max(sent_len).astype(jnp.int32), 1, T).reshape(1)

    def pad_wih(w):                                       # (E,4H) -> (E_pad,4H)
        return jnp.pad(w, ((0, pad_e), (0, 0)))

    # both directions' input projections concatenated along the output axis
    wih = jnp.concatenate([pad_wih(params['wih_f']), pad_wih(params['wih_b'])],
                          axis=1).astype(jnp.bfloat16)                 # (E_pad, 8H)
    whh = jnp.stack([params['whh_f'], params['whh_b']]).astype(jnp.bfloat16)  # (2,H,4H)
    b = jnp.concatenate([params['b_f'], params['b_b']],
                        axis=1).astype(jnp.float32)                    # (1, 8H)

    kernel = _make_infersent_kernel(T, B_pad, E_pad, H, pool_type)

    grid_spec = pltpu.PrefetchScalarGridSpec(
        num_scalar_prefetch=1,                            # max_len -> SMEM
        grid=(1,),                                        # single fused program
        in_specs=[
            pl.BlockSpec((B_pad, 1), lambda i, ml: (0, 0)),            # lens
            pl.BlockSpec((T * B_pad, E_pad), lambda i, ml: (0, 0)),    # x
            pl.BlockSpec((E_pad, 2 * G), lambda i, ml: (0, 0)),        # W_ih
            pl.BlockSpec((2, H, G), lambda i, ml: (0, 0, 0)),          # W_hh
            pl.BlockSpec((1, 2 * G), lambda i, ml: (0, 0)),            # bias
        ],
        out_specs=pl.BlockSpec((B_pad, 2 * H), lambda i, ml: (0, 0)),
        scratch_shapes=[pltpu.VMEM((T * B_pad, 2 * G), jnp.float32)]   # gates
                      + [pltpu.VMEM((B_pad, H), jnp.float32)] * 6,     # h/c/acc
    )

    out = pl.pallas_call(
        kernel,
        out_shape=jax.ShapeDtypeStruct((B_pad, 2 * H), jnp.float32),
        grid_spec=grid_spec,
        compiler_params=pltpu.CompilerParams(
            dimension_semantics=("arbitrary",),
            # demo VMEM footprint is <2 MiB; for production shapes raise
            # vmem_limit_bytes (~100 MiB v5e/v6e, ~56 MiB v7x).
        ),
    )(max_len, lens, x2d, wih, whh, b)

    return out[:B]                                        # (B, 2H)


def init_lstm_params(key, E, H):
    """Deterministic init matching nn.LSTM shapes (uniform(-1/sqrt(H), 1/sqrt(H)))."""
    k = 1.0 / (H ** 0.5)
    keys = jax.random.split(key, 8)

    def u(kk, shape):
        return jax.random.uniform(kk, shape, jnp.float32, minval=-k, maxval=k)

    # PyTorch layout: weight_ih (4H, E), weight_hh (4H, H), biases (4H,)
    w_ih_f, w_hh_f = u(keys[0], (4 * H, E)), u(keys[1], (4 * H, H))
    b_ih_f, b_hh_f = u(keys[2], (4 * H,)), u(keys[3], (4 * H,))
    w_ih_b, w_hh_b = u(keys[4], (4 * H, E)), u(keys[5], (4 * H, H))
    b_ih_b, b_hh_b = u(keys[6], (4 * H,)), u(keys[7], (4 * H,))

    return {
        'wih_f': w_ih_f.T,                              # (E, 4H)
        'whh_f': w_hh_f.T,                              # (H, 4H)
        'b_f': (b_ih_f + b_hh_f).reshape(1, 4 * H),     # (1, 4H)
        'wih_b': w_ih_b.T,
        'whh_b': w_hh_b.T,
        'b_b': (b_ih_b + b_hh_b).reshape(1, 4 * H),
    }


def infersent_ref(sent, sent_len, params, pool_type='max',
                  matmul_dtype=jnp.float32):
    """Pure-JAX reference. matmul_dtype=bfloat16 mirrors the kernel precision."""
    T, B, E = sent.shape
    H = params['whh_f'].shape[0]
    lens = sent_len.astype(jnp.int32).reshape(B, 1)

    def mm(a, w):
        return jnp.dot(a.astype(matmul_dtype), w.astype(matmul_dtype),
                       preferred_element_type=jnp.float32)

    def cell(xt, h, c, wih, whh, b):
        g = mm(xt, wih) + mm(h, whh) + b
        i = jax.nn.sigmoid(g[:, :H])
        f = jax.nn.sigmoid(g[:, H:2 * H])
        gg = jnp.tanh(g[:, 2 * H:3 * H])
        o = jax.nn.sigmoid(g[:, 3 * H:])
        c2 = f * c + i * gg
        return o * jnp.tanh(c2), c2

    outs_f = []
    h = c = jnp.zeros((B, H), jnp.float32)
    for t in range(T):
        hn, cn = cell(sent[t], h, c, params['wih_f'], params['whh_f'], params['b_f'])
        valid = t < lens
        outs_f.append(jnp.where(valid, hn, 0.0))
        h = jnp.where(valid, hn, h)
        c = jnp.where(valid, cn, c)

    outs_b = [None] * T
    h = c = jnp.zeros((B, H), jnp.float32)
    for t in range(T - 1, -1, -1):
        hn, cn = cell(sent[t], h, c, params['wih_b'], params['whh_b'], params['b_b'])
        valid = t < lens
        outs_b[t] = jnp.where(valid, hn, 0.0)
        h = jnp.where(valid, hn, h)
        c = jnp.where(valid, cn, c)

    out = jnp.concatenate([jnp.stack(outs_f), jnp.stack(outs_b)], axis=-1)  # (T,B,2H)
    max_len = int(jnp.max(sent_len))
    out = out[:max_len]
    if pool_type == 'max':
        return jnp.max(out, axis=0)
    return jnp.sum(out, axis=0) / sent_len.reshape(B, 1).astype(jnp.float32)


if __name__ == "__main__":
    # config ~ {'word_emb_dim': 32, 'enc_lstm_dim': 128, 'pool_type': 'max',
    #           'dpout_model': 0.0, 'bsize': 4, 'version': 1}
    # H=128 keeps gate slices and the output store lane-aligned.
    T, B, E, H = 8, 4, 32, 128

    key = jax.random.PRNGKey(0)
    k_x, k_p = jax.random.split(key)

    sent = jax.random.normal(k_x, (T, B, E), dtype=jnp.float32)
    sent_len = jnp.array([8, 5, 3, 8], dtype=jnp.int32)     # padded batch
    # zero out padded word embeddings like get_batch() would
    t_idx = jnp.arange(T).reshape(T, 1, 1)
    sent = jnp.where(t_idx < sent_len.reshape(1, B, 1), sent, 0.0)

    params = init_lstm_params(k_p, E, H)

    for pool_type in ('max', 'mean'):
        emb = infersent_forward(sent, sent_len, params, pool_type=pool_type)
        emb = jax.block_until_ready(emb)
        assert emb.shape == (B, 2 * H)

        # tight check vs a reference using the same bf16-operand matmuls
        # (3e-3 leaves headroom for the approx-reciprocal in the mean path)
        ref_bf16 = infersent_ref(sent, sent_len, params, pool_type,
                                 matmul_dtype=jnp.bfloat16)
        assert jnp.allclose(emb, ref_bf16, rtol=3e-3, atol=3e-3), \
            f"kernel/bf16-reference mismatch ({pool_type})"

        # looser semantic check vs the full-f32 reference
        ref_f32 = infersent_ref(sent, sent_len, params, pool_type,
                                matmul_dtype=jnp.float32)
        assert jnp.allclose(emb, ref_f32, rtol=5e-2, atol=5e-2), \
            f"kernel/f32-reference mismatch ({pool_type})"

    print("KERNEL_OK")
</pallas_src>

<mosaic_0001>
module attributes {stable_mosaic.version = 11 : i64} {
  func.func @kernel(%arg0: i32, %arg1: memref<1xi32, #tpu.memory_space<smem>>, %arg2: memref<8x1xi32, #tpu.memory_space<vmem>>, %arg3: memref<64x128xbf16, #tpu.memory_space<vmem>>, %arg4: memref<128x1024xbf16, #tpu.memory_space<vmem>>, %arg5: memref<2x128x512xbf16, #tpu.memory_space<vmem>>, %arg6: memref<1x1024xf32, #tpu.memory_space<vmem>>, %arg7: memref<8x256xf32, #tpu.memory_space<vmem>>, %arg8: memref<64x1024xf32, #tpu.memory_space<vmem>>, %arg9: memref<8x128xf32, #tpu.memory_space<vmem>>, %arg10: memref<8x128xf32, #tpu.memory_space<vmem>>, %arg11: memref<8x128xf32, #tpu.memory_space<vmem>>, %arg12: memref<8x128xf32, #tpu.memory_space<vmem>>, %arg13: memref<8x128xf32, #tpu.memory_space<vmem>>, %arg14: memref<8x128xf32, #tpu.memory_space<vmem>>) attributes {dimension_semantics = [#tpu.dimension_semantics<arbitrary>], iteration_bounds = array<i64: 1>, scalar_prefetch = 1 : i64, scratch_operands = 7 : i64, tpu.core_type = #tpu.core_type<tc>, window_params = [{pipeline_mode = #tpu.pipeline_mode<synchronous>, transform_indices = @transform_0, window_bounds = array<i64: 8, 1>}, {pipeline_mode = #tpu.pipeline_mode<synchronous>, transform_indices = @transform_1, window_bounds = array<i64: 64, 128>}, {pipeline_mode = #tpu.pipeline_mode<synchronous>, transform_indices = @transform_2, window_bounds = array<i64: 128, 1024>}, {pipeline_mode = #tpu.pipeline_mode<synchronous>, transform_indices = @transform_3, window_bounds = array<i64: 2, 128, 512>}, {pipeline_mode = #tpu.pipeline_mode<synchronous>, transform_indices = @transform_4, window_bounds = array<i64: 1, 1024>}, {pipeline_mode = #tpu.pipeline_mode<synchronous>, transform_indices = @transform_5, window_bounds = array<i64: 8, 256>}]} {
    %c0 = arith.constant 0 : index
    %0 = memref.load %arg1[%c0] : memref<1xi32, #tpu.memory_space<smem>>
    %c0_0 = arith.constant 0 : index
    %c0_1 = arith.constant 0 : index
    %1 = vector.load %arg2[%c0_0, %c0_1] : memref<8x1xi32, #tpu.memory_space<vmem>>, vector<8x1xi32>
    %2 = vector.shape_cast %1 : vector<8x1xi32> to vector<8x1xi32>
    %3 = vector.broadcast %2 : vector<8x1xi32> to vector<8x128xi32>
    %c0_2 = arith.constant 0 : index
    %c0_3 = arith.constant 0 : index
    %4 = vector.load %arg3[%c0_2, %c0_3] : memref<64x128xbf16, #tpu.memory_space<vmem>>, vector<64x128xbf16>
    %c0_4 = arith.constant 0 : index
    %c0_5 = arith.constant 0 : index
    %5 = vector.load %arg4[%c0_4, %c0_5] : memref<128x1024xbf16, #tpu.memory_space<vmem>>, vector<128x1024xbf16>
    %cst = arith.constant dense<0.000000e+00> : vector<64x1024xf32>
    %6 = tpu.matmul %4, %5, %cst {dimension_numbers = #tpu.dot_dimension_numbers<[1], [0], [0], [1], [0, 0, 1, 1], [], []>} : vector<64x128xbf16>, vector<128x1024xbf16>, vector<64x1024xf32> -> vector<64x1024xf32>
    %c0_6 = arith.constant 0 : index
    %c0_7 = arith.constant 0 : index
    %7 = vector.load %arg6[%c0_6, %c0_7] : memref<1x1024xf32, #tpu.memory_space<vmem>>, vector<1x1024xf32>
    %8 = vector.broadcast %7 : vector<1x1024xf32> to vector<64x1024xf32>
    %9 = arith.addf %6, %8 : vector<64x1024xf32>
    %c0_8 = arith.constant 0 : index
    %c0_9 = arith.constant 0 : index
    %10 = vector.load %arg8[%c0_8, %c0_9] : memref<64x1024xf32, #tpu.memory_space<vmem>>, vector<64x1024xf32>
    tpu.vector_store %arg8[%c0_8, %c0_9], %9 {strides = array<i32>} : memref<64x1024xf32, #tpu.memory_space<vmem>>, vector<64x1024xf32>,
    %c0_10 = arith.constant 0 : index
    %c0_11 = arith.constant 0 : index
    %c0_12 = arith.constant 0 : index
    %11 = vector.load %arg5[%c0_10, %c0_11, %c0_12] : memref<2x128x512xbf16, #tpu.memory_space<vmem>>, vector<1x128x512xbf16>
    %12 = vector.shape_cast %11 : vector<1x128x512xbf16> to vector<128x512xbf16>
    %c1 = arith.constant 1 : index
    %c0_13 = arith.constant 0 : index
    %c0_14 = arith.constant 0 : index
    %13 = vector.load %arg5[%c1, %c0_13, %c0_14] : memref<2x128x512xbf16, #tpu.memory_space<vmem>>, vector<1x128x512xbf16>
    %14 = vector.shape_cast %13 : vector<1x128x512xbf16> to vector<128x512xbf16>
    %cst_15 = arith.constant 0.000000e+00 : f32
    %15 = vector.broadcast %cst_15 : f32 to vector<8x128xf32>
    %c0_16 = arith.constant 0 : index
    %c0_17 = arith.constant 0 : index
    %16 = vector.load %arg9[%c0_16, %c0_17] : memref<8x128xf32, #tpu.memory_space<vmem>>, vector<8x128xf32>
    tpu.vector_store %arg9[%c0_16, %c0_17], %15 {strides = array<i32>} : memref<8x128xf32, #tpu.memory_space<vmem>>, vector<8x128xf32>,
    %c0_18 = arith.constant 0 : index
    %c0_19 = arith.constant 0 : index
    %17 = vector.load %arg10[%c0_18, %c0_19] : memref<8x128xf32, #tpu.memory_space<vmem>>, vector<8x128xf32>
    tpu.vector_store %arg10[%c0_18, %c0_19], %15 {strides = array<i32>} : memref<8x128xf32, #tpu.memory_space<vmem>>, vector<8x128xf32>,
    %c0_20 = arith.constant 0 : index
    %c0_21 = arith.constant 0 : index
    %18 = vector.load %arg11[%c0_20, %c0_21] : memref<8x128xf32, #tpu.memory_space<vmem>>, vector<8x128xf32>
    tpu.vector_store %arg11[%c0_20, %c0_21], %15 {strides = array<i32>} : memref<8x128xf32, #tpu.memory_space<vmem>>, vector<8x128xf32>,
    %c0_22 = arith.constant 0 : index
    %c0_23 = arith.constant 0 : index
    %19 = vector.load %arg12[%c0_22, %c0_23] : memref<8x128xf32, #tpu.memory_space<vmem>>, vector<8x128xf32>
    tpu.vector_store %arg12[%c0_22, %c0_23], %15 {strides = array<i32>} : memref<8x128xf32, #tpu.memory_space<vmem>>, vector<8x128xf32>,
    %cst_24 = arith.constant 0xFF800000 : f32
    %20 = vector.broadcast %cst_24 : f32 to vector<8x128xf32>
    %c0_25 = arith.constant 0 : index
    %c0_26 = arith.constant 0 : index
    %21 = vector.load %arg13[%c0_25, %c0_26] : memref<8x128xf32, #tpu.memory_space<vmem>>, vector<8x128xf32>
    tpu.vector_store %arg13[%c0_25, %c0_26], %20 {strides = array<i32>} : memref<8x128xf32, #tpu.memory_space<vmem>>, vector<8x128xf32>,
    %c0_27 = arith.constant 0 : index
    %c0_28 = arith.constant 0 : index
    %22 = vector.load %arg14[%c0_27, %c0_28] : memref<8x128xf32, #tpu.memory_space<vmem>>, vector<8x128xf32>
    tpu.vector_store %arg14[%c0_27, %c0_28], %20 {strides = array<i32>} : memref<8x128xf32, #tpu.memory_space<vmem>>, vector<8x128xf32>,
    %c0_i32 = arith.constant 0 : i32
    %23 = arith.subi %0, %c0_i32 : i32
    %c1_i32 = arith.constant 1 : i32
    %c1_i32_29 = arith.constant 1 : i32
    %24 = arith.subi %c1_i32, %c1_i32_29 : i32
    %25 = arith.addi %23, %24 : i32
    %c1_i32_30 = arith.constant 1 : i32
    %26 = arith.divsi %25, %c1_i32_30 : i32
    %c1_i32_31 = arith.constant 1 : i32
    %c0_i32_32 = arith.constant 0 : i32
    %c0_i32_33 = arith.constant 0 : i32
    %27 = arith.subi %26, %c0_i32_33 : i32
    %28 = arith.addi %c0_i32_33, %27 : i32
    %c1_i32_34 = arith.constant 1 : i32
    scf.for %arg15 = %c0_i32_33 to %28 step %c1_i32_34  : i32 {
      %33 = arith.muli %arg15, %c1_i32_31 : i32
      %34 = arith.addi %c0_i32_32, %33 : i32
      %c1_i32_42 = arith.constant 1 : i32
      %35 = arith.subi %0, %c1_i32_42 : i32
      %36 = arith.subi %35, %34 : i32
      %c8_i32 = arith.constant 8 : i32
      %37 = arith.muli %34, %c8_i32 : i32
      %38 = tpu.assume_multiple %37, 8 : i32
      %c8_i32_43 = arith.constant 8 : i32
      %39 = arith.muli %36, %c8_i32_43 : i32
      %40 = tpu.assume_multiple %39, 8 : i32
      %c0_44 = arith.constant 0 : index
      %c0_45 = arith.constant 0 : index
      %41 = vector.load %arg9[%c0_44, %c0_45] : memref<8x128xf32, #tpu.memory_space<vmem>>, vector<8x128xf32>
      %c0_46 = arith.constant 0 : index
      %c0_47 = arith.constant 0 : index
      %42 = vector.load %arg10[%c0_46, %c0_47] : memref<8x128xf32, #tpu.memory_space<vmem>>, vector<8x128xf32>
      %c0_48 = arith.constant 0 : index
      %c0_49 = arith.constant 0 : index
      %43 = vector.load %arg11[%c0_48, %c0_49] : memref<8x128xf32, #tpu.memory_space<vmem>>, vector<8x128xf32>
      %c0_50 = arith.constant 0 : index
      %c0_51 = arith.constant 0 : index
      %44 = vector.load %arg12[%c0_50, %c0_51] : memref<8x128xf32, #tpu.memory_space<vmem>>, vector<8x128xf32>
      %45 = arith.index_cast %38 : i32 to index
      %c0_52 = arith.constant 0 : index
      %46 = vector.load %arg8[%45, %c0_52] : memref<64x1024xf32, #tpu.memory_space<vmem>>, vector<8x512xf32>
      %47 = arith.truncf %41 : vector<8x128xf32> to vector<8x128xbf16>
      %cst_53 = arith.constant dense<0.000000e+00> : vector<8x512xf32>
      %48 = tpu.matmul %47, %12, %cst_53 {dimension_numbers = #tpu.dot_dimension_numbers<[1], [0], [0], [1], [0, 0, 1, 1], [], []>} : vector<8x128xbf16>, vector<128x512xbf16>, vector<8x512xf32> -> vector<8x512xf32>
      %49 = arith.addf %46, %48 : vector<8x512xf32>
      %50 = arith.index_cast %40 : i32 to index
      %c512 = arith.constant 512 : index
      %51 = vector.load %arg8[%50, %c512] : memref<64x1024xf32, #tpu.memory_space<vmem>>, vector<8x512xf32>
      %52 = arith.truncf %43 : vector<8x128xf32> to vector<8x128xbf16>
      %cst_54 = arith.constant dense<0.000000e+00> : vector<8x512xf32>
      %53 = tpu.matmul %52, %14, %cst_54 {dimension_numbers = #tpu.dot_dimension_numbers<[1], [0], [0], [1], [0, 0, 1, 1], [], []>} : vector<8x128xbf16>, vector<128x512xbf16>, vector<8x512xf32> -> vector<8x512xf32>
      %54 = arith.addf %51, %53 : vector<8x512xf32>
      %55 = vector.extract_strided_slice %49 {offsets = [0, 0], sizes = [8, 128], strides = [1, 1]} : vector<8x512xf32> to vector<8x128xf32>
      %56 = arith.negf %55 : vector<8x128xf32>
      %57 = math.exp %56 : vector<8x128xf32>
      %cst_55 = arith.constant 1.000000e+00 : f32
      %58 = vector.broadcast %cst_55 : f32 to vector<8x128xf32>
      %59 = arith.addf %58, %57 : vector<8x128xf32>
      %60 = arith.divf %58, %59 : vector<8x128xf32>
      %61 = vector.extract_strided_slice %49 {offsets = [0, 128], sizes = [8, 128], strides = [1, 1]} : vector<8x512xf32> to vector<8x128xf32>
      %62 = arith.negf %61 : vector<8x128xf32>
      %63 = math.exp %62 : vector<8x128xf32>
      %cst_56 = arith.constant 1.000000e+00 : f32
      %64 = vector.broadcast %cst_56 : f32 to vector<8x128xf32>
      %65 = arith.addf %64, %63 : vector<8x128xf32>
      %66 = arith.divf %64, %65 : vector<8x128xf32>
      %67 = vector.extract_strided_slice %49 {offsets = [0, 256], sizes = [8, 128], strides = [1, 1]} : vector<8x512xf32> to vector<8x128xf32>
      %68 = math.tanh %67 : vector<8x128xf32>
      %69 = vector.extract_strided_slice %49 {offsets = [0, 384], sizes = [8, 128], strides = [1, 1]} : vector<8x512xf32> to vector<8x128xf32>
      %70 = arith.negf %69 : vector<8x128xf32>
      %71 = math.exp %70 : vector<8x128xf32>
      %cst_57 = arith.constant 1.000000e+00 : f32
      %72 = vector.broadcast %cst_57 : f32 to vector<8x128xf32>
      %73 = arith.addf %72, %71 : vector<8x128xf32>
      %74 = arith.divf %72, %73 : vector<8x128xf32>
      %75 = arith.mulf %66, %42 : vector<8x128xf32>
      %76 = arith.mulf %60, %68 : vector<8x128xf32>
      %77 = arith.addf %75, %76 : vector<8x128xf32>
      %78 = math.tanh %77 : vector<8x128xf32>
      %79 = arith.mulf %74, %78 : vector<8x128xf32>
      %80 = vector.extract_strided_slice %54 {offsets = [0, 0], sizes = [8, 128], strides = [1, 1]} : vector<8x512xf32> to vector<8x128xf32>
      %81 = arith.negf %80 : vector<8x128xf32>
      %82 = math.exp %81 : vector<8x128xf32>
      %cst_58 = arith.constant 1.000000e+00 : f32
      %83 = vector.broadcast %cst_58 : f32 to vector<8x128xf32>
      %84 = arith.addf %83, %82 : vector<8x128xf32>
      %85 = arith.divf %83, %84 : vector<8x128xf32>
      %86 = vector.extract_strided_slice %54 {offsets = [0, 128], sizes = [8, 128], strides = [1, 1]} : vector<8x512xf32> to vector<8x128xf32>
      %87 = arith.negf %86 : vector<8x128xf32>
      %88 = math.exp %87 : vector<8x128xf32>
      %cst_59 = arith.constant 1.000000e+00 : f32
      %89 = vector.broadcast %cst_59 : f32 to vector<8x128xf32>
      %90 = arith.addf %89, %88 : vector<8x128xf32>
      %91 = arith.divf %89, %90 : vector<8x128xf32>
      %92 = vector.extract_strided_slice %54 {offsets = [0, 256], sizes = [8, 128], strides = [1, 1]} : vector<8x512xf32> to vector<8x128xf32>
      %93 = math.tanh %92 : vector<8x128xf32>
      %94 = vector.extract_strided_slice %54 {offsets = [0, 384], sizes = [8, 128], strides = [1, 1]} : vector<8x512xf32> to vector<8x128xf32>
      %95 = arith.negf %94 : vector<8x128xf32>
      %96 = math.exp %95 : vector<8x128xf32>
      %cst_60 = arith.constant 1.000000e+00 : f32
      %97 = vector.broadcast %cst_60 : f32 to vector<8x128xf32>
      %98 = arith.addf %97, %96 : vector<8x128xf32>
      %99 = arith.divf %97, %98 : vector<8x128xf32>
      %100 = arith.mulf %91, %44 : vector<8x128xf32>
      %101 = arith.mulf %85, %93 : vector<8x128xf32>
      %102 = arith.addf %100, %101 : vector<8x128xf32>
      %103 = math.tanh %102 : vector<8x128xf32>
      %104 = arith.mulf %99, %103 : vector<8x128xf32>
      %105 = vector.broadcast %34 : i32 to vector<8x128xi32>
      %106 = arith.cmpi slt, %105, %3 : vector<8x128xi32>
      %107 = vector.broadcast %36 : i32 to vector<8x128xi32>
      %108 = arith.cmpi slt, %107, %3 : vector<8x128xi32>
      %cst_61 = arith.constant 0.000000e+00 : f32
      %109 = vector.broadcast %cst_61 : f32 to vector<8x128xf32>
      %110 = arith.select %106, %79, %109 : vector<8x128xi1>, vector<8x128xf32>
      %cst_62 = arith.constant 0.000000e+00 : f32
      %111 = vector.broadcast %cst_62 : f32 to vector<8x128xf32>
      %112 = arith.select %108, %104, %111 : vector<8x128xi1>, vector<8x128xf32>
      %c0_63 = arith.constant 0 : index
      %c0_64 = arith.constant 0 : index
      %113 = vector.load %arg13[%c0_63, %c0_64] : memref<8x128xf32, #tpu.memory_space<vmem>>, vector<8x128xf32>
      %114 = arith.maximumf %113, %110 : vector<8x128xf32>
      %c0_65 = arith.constant 0 : index
      %c0_66 = arith.constant 0 : index
      %115 = vector.load %arg13[%c0_65, %c0_66] : memref<8x128xf32, #tpu.memory_space<vmem>>, vector<8x128xf32>
      tpu.vector_store %arg13[%c0_65, %c0_66], %114 {strides = array<i32>} : memref<8x128xf32, #tpu.memory_space<vmem>>, vector<8x128xf32>,
      %c0_67 = arith.constant 0 : index
      %c0_68 = arith.constant 0 : index
      %116 = vector.load %arg14[%c0_67, %c0_68] : memref<8x128xf32, #tpu.memory_space<vmem>>, vector<8x128xf32>
      %117 = arith.maximumf %116, %112 : vector<8x128xf32>
      %c0_69 = arith.constant 0 : index
      %c0_70 = arith.constant 0 : index
      %118 = vector.load %arg14[%c0_69, %c0_70] : memref<8x128xf32, #tpu.memory_space<vmem>>, vector<8x128xf32>
      tpu.vector_store %arg14[%c0_69, %c0_70], %117 {strides = array<i32>} : memref<8x128xf32, #tpu.memory_space<vmem>>, vector<8x128xf32>,
      %119 = arith.select %106, %79, %41 : vector<8x128xi1>, vector<8x128xf32>
      %c0_71 = arith.constant 0 : index
      %c0_72 = arith.constant 0 : index
      %120 = vector.load %arg9[%c0_71, %c0_72] : memref<8x128xf32, #tpu.memory_space<vmem>>, vector<8x128xf32>
      tpu.vector_store %arg9[%c0_71, %c0_72], %119 {strides = array<i32>} : memref<8x128xf32, #tpu.memory_space<vmem>>, vector<8x128xf32>,
      %121 = arith.select %106, %77, %42 : vector<8x128xi1>, vector<8x128xf32>
      %c0_73 = arith.constant 0 : index
      %c0_74 = arith.constant 0 : index
      %122 = vector.load %arg10[%c0_73, %c0_74] : memref<8x128xf32, #tpu.memory_space<vmem>>, vector<8x128xf32>
      tpu.vector_store %arg10[%c0_73, %c0_74], %121 {strides = array<i32>} : memref<8x128xf32, #tpu.memory_space<vmem>>, vector<8x128xf32>,
      %123 = arith.select %108, %104, %43 : vector<8x128xi1>, vector<8x128xf32>
      %c0_75 = arith.constant 0 : index
      %c0_76 = arith.constant 0 : index
      %124 = vector.load %arg11[%c0_75, %c0_76] : memref<8x128xf32, #tpu.memory_space<vmem>>, vector<8x128xf32>
      tpu.vector_store %arg11[%c0_75, %c0_76], %123 {strides = array<i32>} : memref<8x128xf32, #tpu.memory_space<vmem>>, vector<8x128xf32>,
      %125 = arith.select %108, %102, %44 : vector<8x128xi1>, vector<8x128xf32>
      %c0_77 = arith.constant 0 : index
      %c0_78 = arith.constant 0 : index
      %126 = vector.load %arg12[%c0_77, %c0_78] : memref<8x128xf32, #tpu.memory_space<vmem>>, vector<8x128xf32>
      tpu.vector_store %arg12[%c0_77, %c0_78], %125 {strides = array<i32>} : memref<8x128xf32, #tpu.memory_space<vmem>>, vector<8x128xf32>,
    }
    %c0_35 = arith.constant 0 : index
    %c0_36 = arith.constant 0 : index
    %29 = vector.load %arg13[%c0_35, %c0_36] : memref<8x128xf32, #tpu.memory_space<vmem>>, vector<8x128xf32>
    %c0_37 = arith.constant 0 : index
    %c0_38 = arith.constant 0 : index
    %30 = vector.load %arg7[%c0_37, %c0_38] : memref<8x256xf32, #tpu.memory_space<vmem>>, vector<8x128xf32>
    tpu.vector_store %arg7[%c0_37, %c0_38], %29 {strides = array<i32>} : memref<8x256xf32, #tpu.memory_space<vmem>>, vector<8x128xf32>,
    %c0_39 = arith.constant 0 : index
    %c0_40 = arith.constant 0 : index
    %31 = vector.load %arg14[%c0_39, %c0_40] : memref<8x128xf32, #tpu.memory_space<vmem>>, vector<8x128xf32>
    %c0_41 = arith.constant 0 : index
    %c128 = arith.constant 128 : index
    %32 = vector.load %arg7[%c0_41, %c128] : memref<8x256xf32, #tpu.memory_space<vmem>>, vector<8x128xf32>
    tpu.vector_store %arg7[%c0_41, %c128], %31 {strides = array<i32>} : memref<8x256xf32, #tpu.memory_space<vmem>>, vector<8x128xf32>,
    return
  }
  func.func @transform_0(%arg0: i32, %arg1: memref<1xi32, #tpu.memory_space<smem>>) -> (i32, i32) {
    %c0_i32 = arith.constant 0 : i32
    %c0_i32_0 = arith.constant 0 : i32
    %c0_i32_1 = arith.constant 0 : i32
    return %c0_i32, %c0_i32_0 : i32, i32
  }
  func.func @transform_1(%arg0: i32, %arg1: memref<1xi32, #tpu.memory_space<smem>>) -> (i32, i32) {
    %c0_i32 = arith.constant 0 : i32
    %c0_i32_0 = arith.constant 0 : i32
    %c0_i32_1 = arith.constant 0 : i32
    return %c0_i32, %c0_i32_0 : i32, i32
  }
  func.func @transform_2(%arg0: i32, %arg1: memref<1xi32, #tpu.memory_space<smem>>) -> (i32, i32) {
    %c0_i32 = arith.constant 0 : i32
    %c0_i32_0 = arith.constant 0 : i32
    %c0_i32_1 = arith.constant 0 : i32
    return %c0_i32, %c0_i32_0 : i32, i32
  }
  func.func @transform_3(%arg0: i32, %arg1: memref<1xi32, #tpu.memory_space<smem>>) -> (i32, i32, i32) {
    %c0_i32 = arith.constant 0 : i32
    %c0_i32_0 = arith.constant 0 : i32
    %c0_i32_1 = arith.constant 0 : i32
    %c0_i32_2 = arith.constant 0 : i32
    return %c0_i32, %c0_i32_0, %c0_i32_1 : i32, i32, i32
  }
  func.func @transform_4(%arg0: i32, %arg1: memref<1xi32, #tpu.memory_space<smem>>) -> (i32, i32) {
    %c0_i32 = arith.constant 0 : i32
    %c0_i32_0 = arith.constant 0 : i32
    %c0_i32_1 = arith.constant 0 : i32
    return %c0_i32, %c0_i32_0 : i32, i32
  }
  func.func @transform_5(%arg0: i32, %arg1: memref<1xi32, #tpu.memory_space<smem>>) -> (i32, i32) {
    %c0_i32 = arith.constant 0 : i32
    %c0_i32_0 = arith.constant 0 : i32
    %c0_i32_1 = arith.constant 0 : i32
    return %c0_i32, %c0_i32_0 : i32, i32
  }
}

</mosaic_0001>

<bundles_post_ra>
// kernel: tpu_custom_call.1
= control target key start
LH: loop header
LB: loop body
LE: loop exit
PB: predicated region body
PF: predicated region fallthrough
CT: control target
= control target key end

     0   :  { %12 = vsyncpa [#allocation12], 0  ;;  %s2427_s0 = inlined_call_operand.<no memory space> [shape: s32[1], index: 0, kind: input, shape index: {}]   ;;  %s2428_s1 = inlined_call_operand.vmem [shape: s32[8,1], index: 1, kind: input, shape index: {}]   ;;  %s2429_s2 = inlined_call_operand.hbm [shape: bf16[64,128], index: 2, kind: input, shape index: {}]   ;;  %s2430_s3 = inlined_call_operand.hbm [shape: bf16[128,1024], index: 3, kind: input, shape index: {}]   ;;  %s2431_s4 = inlined_call_operand.hbm [shape: bf16[2,128,512], index: 4, kind: input, shape index: {}]   ;;  %s2432_s5 = inlined_call_operand.vmem [shape: f32[1,1024], index: 5, kind: input, shape index: {}]   ;;  %s2433_s6 = inlined_call_operand.hbm [shape: f32[8,256], index: 6, kind: output, shape index: {}]  }
   0x1   :  { %13 = vsyncpa [#allocation15], 0 }
   0x2   :  { %14 = vsyncpa [#allocation13], 0  ;;  %s1887_s21 = smov [#allocation14]   ;;  %s1785_s25 = scalar_lea.hbm %s2430_s3, 8192 }
   0x3   :  { %s34_s22 = sshll.u32 %s1887_s21, 4  ;;  %p1786_p0 = scmp.ne.s32.totalorder %s2430_s3, %s1785_s25  ;;  %s35_s22 = int_to_ptr.vmem [resolvable:$true] %s34_s22 }
   0x4   :  { %p1789_p1 = scmp.lt.u32.totalorder %s1785_s25, %s2430_s3 }
   0x6   :  { %p1791_p2 = pnand %p1789_p1, %p1786_p0 }
   0x8   :  { %1794 = shalt.err (!%p1791_p2)
}
   0x9   :  { %s1795_s30 = scalar_lea.vmem %s35_s22, 8192  ;;  %p1800_p4 = scmp.lt.s32.totalorder %s35_s22, %s35_s22 }
   0xa   :  { %p1796_p3 = scmp.ne.s32.totalorder %s35_s22, %s1795_s30  ;;  %p1801_p5 = scmp.lt.s32.totalorder %s1795_s30, %s1795_s30 }
   0xc   :  { %p1802_p6 = por %p1801_p5, %p1800_p4 }
   0xe   :  { %p1803_p7 = pnand %p1802_p6, %p1796_p3 }
  0x10   :  { %1806 = shalt.err (!%p1803_p7)
}
  0x11   :  { %s1888_s7 = smov 512   ;;  %s1889_s8 = smov 32  }
  0x12   :  { %40 = dma.hbm_to_vmem [thread:$0]  %s2430_s3, 8192, %s35_s22, [#allocation15], %s1888_s7, %s1888_s7, %s1889_s8  }
  0x13   :  { %s1890_s11 = smov [#allocation11]   ;;  %s1807_s15 = scalar_lea.hbm %s2429_s2, 512 }
  0x14   :  { %s22_s12 = sshll.u32 %s1890_s11, 4  ;;  %p1808_p8 = scmp.ne.s32.totalorder %s2429_s2, %s1807_s15  ;;  %s23_s12 = int_to_ptr.vmem [resolvable:$true] %s22_s12 }
  0x15   :  { %p1811_p9 = scmp.lt.u32.totalorder %s1807_s15, %s2429_s2 }
  0x17   :  { %p1813_p10 = pnand %p1811_p9, %p1808_p8 }
  0x19   :  { %1816 = shalt.err (!%p1813_p10)
}
  0x1a   :  { %s1817_s20 = scalar_lea.vmem %s23_s12, 512  ;;  %p1822_p12 = scmp.lt.s32.totalorder %s23_s12, %s23_s12 }
  0x1b   :  { %p1818_p11 = scmp.ne.s32.totalorder %s23_s12, %s1817_s20  ;;  %p1823_p13 = scmp.lt.s32.totalorder %s1817_s20, %s1817_s20 }
  0x1d   :  { %p1824_p0 = por %p1823_p13, %p1822_p12 }
  0x1f   :  { %p1825_p1 = pnand %p1824_p0, %p1818_p11 }
  0x21   :  { %1828 = shalt.err (!%p1825_p1)
}
  0x22   :  { %s1891_s3 = smov 64   ;;  %s1892_s21 = smov 4  }
  0x23   :  { %28 = dma.hbm_to_vmem [thread:$0]  %s2429_s2, 512, %s23_s12, [#allocation12], %s1891_s3, %s1891_s3, %s1892_s21  }
  0x24   :  { %s1893_s24 = smov [#allocation16]   ;;  %s1829_s28 = scalar_lea.hbm %s2431_s4, 8192 }
  0x25   :  { %s46_s25 = sshll.u32 %s1893_s24, 4  ;;  %p1830_p2 = scmp.ne.s32.totalorder %s2431_s4, %s1829_s28  ;;  %s47_s25 = int_to_ptr.vmem [resolvable:$true] %s46_s25 }
  0x26   :  { %p1833_p3 = scmp.lt.u32.totalorder %s1829_s28, %s2431_s4 }
  0x28   :  { %p1835_p4 = pnand %p1833_p3, %p1830_p2 }
  0x2a   :  { %1838 = shalt.err (!%p1835_p4)
}
  0x2b   :  { %s1839_s9 = scalar_lea.vmem %s47_s25, 8192  ;;  %p1844_p6 = scmp.lt.s32.totalorder %s47_s25, %s47_s25 }
  0x2c   :  { %p1840_p5 = scmp.ne.s32.totalorder %s47_s25, %s1839_s9  ;;  %p1845_p7 = scmp.lt.s32.totalorder %s1839_s9, %s1839_s9 }
  0x2e   :  { %p1846_p8 = por %p1845_p7, %p1844_p6 }
  0x30   :  { %p1847_p9 = pnand %p1846_p8, %p1840_p5 }
  0x32   :  { %1850 = shalt.err (!%p1847_p9)
}
  0x33   :  { %s1894_s2 = smov 256   ;;  %s1895_s10 = smov 16  }
  0x34   :  { %52 = dma.hbm_to_vmem [thread:$0]  %s2431_s4, 8192, %s47_s25, [#allocation15], %s1894_s2, %s1894_s2, %s1895_s10  }
  0x35   :  { %1877 = dma.done.wait [#allocation12], 512  }
  0x36   :  { %1878 = vsyncadd [#allocation12], 4294966784 }
  0x37   :  { %1879 = dma.done.wait [#allocation15], 16384  }
  0x38   :  { %1880 = vsyncadd [#allocation15], 4294950912  ;;  %v1896_v0 = vmov 0.0   ;;  %v1897_v1 = vmov -inf   ;;  %v2434_v2 = vmov 0   ;;  %v1975_v3 = vld [vmem:[#allocation16] sm:$0xff] }
  0x39   :  { %949 = vst [vmem:[#allocation3] sm:$0xff] %v1896_v0  ;;  %950 = vst [vmem:[#allocation4] sm:$0xff] %v1896_v0  ;;  %560 = vmatprep.mubr.bf16.mxu0 %v2434_v2  ;;  %633 = vmatprep.mubr.bf16.mxu1 %v2434_v2  ;;  %v1977_v4 = vld [vmem:[#allocation16 + $0x8] sm:$0xff]  ;;  %v1979_v5 = vld [vmem:[#allocation16 + $0x10] sm:$0xff]  ;;  %p1646_p10 = scmp.le.s32.totalorder %s2427_s0, 0 }
  0x3a   :  { %951 = vst [vmem:[#allocation5] sm:$0xff] %v1896_v0  ;;  %952 = vst [vmem:[#allocation6] sm:$0xff] %v1896_v0  ;;  %1748 = vset.pattern.permute.xlu0 %v2434_v2  ;;  %v1981_v6 = vld [vmem:[#allocation16 + $0x18] sm:$0xff]  ;;  %v1983_v7 = vld [vmem:[#allocation16 + $0x20] sm:$0xff]  ;;  %s2240_s16 = smov (!%p1646_p10), 0  }
  0x3b   :  { %953 = vst [vmem:[#allocation7] sm:$0xff] %v1897_v1  ;;  %954 = vst [vmem:[#allocation8] sm:$0xff] %v1897_v1  ;;  %v1985_v8 = vld [vmem:[#allocation16 + $0x28] sm:$0xff]  ;;  %v1987_v9 = vld [vmem:[#allocation16 + $0x30] sm:$0xff] }
  0x3c   :  { %2490 = vst [vmem:[#allocation21_spill] sm:$0xff] %v1975_v3  ;;  %2491 = vst [vmem:[#allocation22_spill] sm:$0xff] %v1977_v4  ;;  %v1989_v10 = vld [vmem:[#allocation16 + $0x38] sm:$0xff]  ;;  %v1991_v11 = vld [vmem:[#allocation16 + $0x40] sm:$0xff] }
  0x3d   :  { %2492 = vst [vmem:[#allocation23_spill] sm:$0xff] %v1979_v5  ;;  %2493 = vst [vmem:[#allocation24_spill] sm:$0xff] %v1981_v6  ;;  %v1993_v12 = vld [vmem:[#allocation16 + $0x48] sm:$0xff]  ;;  %v1995_v13 = vld [vmem:[#allocation16 + $0x50] sm:$0xff] }
  0x3e   :  { %2494 = vst [vmem:[#allocation25_spill] sm:$0xff] %v1983_v7  ;;  %2495 = vst [vmem:[#allocation26_spill] sm:$0xff] %v1985_v8  ;;  %v1997_v14 = vld [vmem:[#allocation16 + $0x58] sm:$0xff]  ;;  %v1999_v15 = vld [vmem:[#allocation16 + $0x60] sm:$0xff] }
  0x3f   :  { %2496 = vst [vmem:[#allocation27_spill] sm:$0xff] %v1987_v9  ;;  %2497 = vst [vmem:[#allocation28_spill] sm:$0xff] %v1989_v10  ;;  %v2001_v16 = vld [vmem:[#allocation16 + $0x68] sm:$0xff]  ;;  %v2003_v17 = vld [vmem:[#allocation16 + $0x70] sm:$0xff] }
  0x40   :  { %2498 = vst [vmem:[#allocation29_spill] sm:$0xff] %v1991_v11  ;;  %2499 = vst [vmem:[#allocation30_spill] sm:$0xff] %v1993_v12  ;;  %v2005_v18 = vld [vmem:[#allocation16 + $0x78] sm:$0xff]  ;;  %v2007_v19 = vld [vmem:[#allocation16 + $0x80] sm:$0xff] }
  0x41   :  { %2500 = vst [vmem:[#allocation31_spill] sm:$0xff] %v1995_v13  ;;  %2501 = vst [vmem:[#allocation32_spill] sm:$0xff] %v1997_v14  ;;  %v2009_v20 = vld [vmem:[#allocation16 + $0x88] sm:$0xff]  ;;  %v2011_v21 = vld [vmem:[#allocation16 + $0x90] sm:$0xff] }
  0x42   :  { %2502 = vst [vmem:[#allocation33_spill] sm:$0xff] %v1999_v15  ;;  %2503 = vst [vmem:[#allocation34_spill] sm:$0xff] %v2001_v16  ;;  %v2013_v22 = vld [vmem:[#allocation16 + $0x98] sm:$0xff]  ;;  %v2015_v23 = vld [vmem:[#allocation16 + $0xa0] sm:$0xff] }
  0x43   :  { %2504 = vst [vmem:[#allocation35_spill] sm:$0xff] %v2003_v17  ;;  %2505 = vst [vmem:[#allocation36_spill] sm:$0xff] %v2005_v18  ;;  %v2017_v24 = vld [vmem:[#allocation16 + $0xa8] sm:$0xff]  ;;  %v2019_v25 = vld [vmem:[#allocation16 + $0xb0] sm:$0xff] }
  0x44   :  { %2506 = vst [vmem:[#allocation37_spill] sm:$0xff] %v2007_v19  ;;  %2507 = vst [vmem:[#allocation38_spill] sm:$0xff] %v2009_v20  ;;  %v2021_v26 = vld [vmem:[#allocation16 + $0xb8] sm:$0xff]  ;;  %v2023_v27 = vld [vmem:[#allocation16 + $0xc0] sm:$0xff] }
  0x45   :  { %2508 = vst [vmem:[#allocation39_spill] sm:$0xff] %v2011_v21  ;;  %v2025_v28 = vld [vmem:[#allocation16 + $0xc8] sm:$0xff]  ;;  %v2027_v29 = vld [vmem:[#allocation16 + $0xd0] sm:$0xff]  ;;  %v2029_v30 = vld [vmem:[#allocation16 + $0xd8] sm:$0xff] }
  0x46   :  { %v2031_v31 = vld [vmem:[#allocation16 + $0xe0] sm:$0xff]  ;;  %v2033_v32 = vld [vmem:[#allocation16 + $0xe8] sm:$0xff]  ;;  %v2035_v33 = vld [vmem:[#allocation16 + $0xf0] sm:$0xff] }
  0x47   :  { %v2037_v34 = vld [vmem:[#allocation16 + $0xf8] sm:$0xff]  ;;  %v2039_v35 = vld [vmem:[#allocation16 + $0x100] sm:$0xff]  ;;  %v2041_v36 = vld [vmem:[#allocation16 + $0x108] sm:$0xff] }
  0x48   :  { %v2043_v37 = vld [vmem:[#allocation16 + $0x110] sm:$0xff]  ;;  %v2045_v38 = vld [vmem:[#allocation16 + $0x118] sm:$0xff]  ;;  %v2047_v39 = vld [vmem:[#allocation16 + $0x120] sm:$0xff] }
  0x49   :  { %2509 = vst [vmem:[#allocation40_spill] sm:$0xff] %v2047_v39  ;;  %v2049_v40 = vld [vmem:[#allocation16 + $0x128] sm:$0xff]  ;;  %v2051_v41 = vld [vmem:[#allocation16 + $0x130] sm:$0xff]  ;;  %v2053_v42 = vld [vmem:[#allocation16 + $0x138] sm:$0xff] }
  0x4a   :  { %2510 = vst [vmem:[#allocation41_spill] sm:$0xff] %v2049_v40  ;;  %2511 = vst [vmem:[#allocation42_spill] sm:$0xff] %v2053_v42  ;;  %v2055_v43 = vld [vmem:[#allocation16 + $0x140] sm:$0xff]  ;;  %v2057_v44 = vld [vmem:[#allocation16 + $0x148] sm:$0xff] }
  0x4b   :  { %2512 = vst [vmem:[#allocation43_spill] sm:$0xff] %v2055_v43  ;;  %2513 = vst [vmem:[#allocation44_spill] sm:$0xff] %v2057_v44  ;;  %v2059_v45 = vld [vmem:[#allocation16 + $0x150] sm:$0xff]  ;;  %v2061_v46 = vld [vmem:[#allocation16 + $0x158] sm:$0xff] }
  0x4c   :  { %2514 = vst [vmem:[#allocation45_spill] sm:$0xff] %v2059_v45  ;;  %2515 = vst [vmem:[#allocation46_spill] sm:$0xff] %v2061_v46  ;;  %v2063_v47 = vld [vmem:[#allocation16 + $0x160] sm:$0xff]  ;;  %v2065_v48 = vld [vmem:[#allocation16 + $0x168] sm:$0xff] }
  0x4d   :  { %2516 = vst [vmem:[#allocation47_spill] sm:$0xff] %v2063_v47  ;;  %2517 = vst [vmem:[#allocation48_spill] sm:$0xff] %v2065_v48  ;;  %v2067_v49 = vld [vmem:[#allocation16 + $0x170] sm:$0xff]  ;;  %v2069_v50 = vld [vmem:[#allocation16 + $0x178] sm:$0xff] }
  0x4e   :  { %2518 = vst [vmem:[#allocation49_spill] sm:$0xff] %v2067_v49  ;;  %2519 = vst [vmem:[#allocation50_spill] sm:$0xff] %v2069_v50  ;;  %v2071_v51 = vld [vmem:[#allocation16 + $0x180] sm:$0xff]  ;;  %v2073_v52 = vld [vmem:[#allocation16 + $0x188] sm:$0xff] }
  0x4f   :  { %2520 = vst [vmem:[#allocation51_spill] sm:$0xff] %v2071_v51  ;;  %2521 = vst [vmem:[#allocation52_spill] sm:$0xff] %v2073_v52  ;;  %v2075_v53 = vld [vmem:[#allocation16 + $0x190] sm:$0xff]  ;;  %v2077_v54 = vld [vmem:[#allocation16 + $0x198] sm:$0xff] }
  0x50   :  { %2522 = vst [vmem:[#allocation53_spill] sm:$0xff] %v2075_v53  ;;  %2523 = vst [vmem:[#allocation54_spill] sm:$0xff] %v2077_v54  ;;  %v2079_v55 = vld [vmem:[#allocation16 + $0x1a0] sm:$0xff]  ;;  %v2081_v56 = vld [vmem:[#allocation16 + $0x1a8] sm:$0xff] }
  0x51   :  { %2524 = vst [vmem:[#allocation55_spill] sm:$0xff] %v2079_v55  ;;  %2525 = vst [vmem:[#allocation56_spill] sm:$0xff] %v2081_v56  ;;  %v2083_v57 = vld [vmem:[#allocation16 + $0x1b0] sm:$0xff]  ;;  %v2085_v58 = vld [vmem:[#allocation16 + $0x1b8] sm:$0xff] }
  0x52   :  { %2526 = vst [vmem:[#allocation57_spill] sm:$0xff] %v2083_v57  ;;  %2527 = vst [vmem:[#allocation58_spill] sm:$0xff] %v2085_v58  ;;  %v2087_v59 = vld [vmem:[#allocation16 + $0x1c0] sm:$0xff]  ;;  %v2089_v60 = vld [vmem:[#allocation16 + $0x1c8] sm:$0xff] }
  0x53   :  { %2528 = vst [vmem:[#allocation59_spill] sm:$0xff] %v2087_v59  ;;  %2529 = vst [vmem:[#allocation60_spill] sm:$0xff] %v2089_v60  ;;  %v2091_v61 = vld [vmem:[#allocation16 + $0x1d0] sm:$0xff]  ;;  %v2093_v62 = vld [vmem:[#allocation16 + $0x1d8] sm:$0xff] }
  0x54   :  { %2530 = vst [vmem:[#allocation61_spill] sm:$0xff] %v2091_v61  ;;  %2531 = vst [vmem:[#allocation62_spill] sm:$0xff] %v2093_v62  ;;  %v2095_v63 = vld [vmem:[#allocation16 + $0x1e0] sm:$0xff]  ;;  %v2097_v0 = vld [vmem:[#allocation16 + $0x1e8] sm:$0xff] }
  0x55   :  { %2532 = vst [vmem:[#allocation63_spill] sm:$0xff] %v2095_v63  ;;  %2533 = vst [vmem:[#allocation64_spill] sm:$0xff] %v2097_v0  ;;  %v2099_v1 = vld [vmem:[#allocation16 + $0x1f0] sm:$0xff]  ;;  %v2101_v2 = vld [vmem:[#allocation16 + $0x1f8] sm:$0xff] }
  0x56   :  { %2534 = vst [vmem:[#allocation65_spill] sm:$0xff] %v2099_v1  ;;  %2535 = vst [vmem:[#allocation66_spill] sm:$0xff] %v2101_v2  ;;  %v78_v56 = vld [vmem:[#allocation14] sm:$0xff]  ;;  %v79_v58 = vld [vmem:[#allocation14 + $0x8] sm:$0xff] }
  0x57   :  { %v82_v55 = vld [vmem:[#allocation14 + $0x20] sm:$0xff]  ;;  %v83_v52 = vld [vmem:[#allocation14 + $0x28] sm:$0xff] }
  0x58   :  { %v1583_v57 = vcombine.high %v78_v56, %v82_v55  ;;  %v1582_v59 = vcombine.low %v78_v56, %v82_v55  ;;  %v86_v54 = vld [vmem:[#allocation14 + $0x40] sm:$0xff]  ;;  %v1585_v60 = vcombine.high %v79_v58, %v83_v52  ;;  %v1584_v51 = vcombine.low %v79_v58, %v83_v52  ;;  %v87_v53 = vld [vmem:[#allocation14 + $0x48] sm:$0xff] }
  0x59   :  { %v90_v61 = vld [vmem:[#allocation14 + $0x60] sm:$0xff]  ;;  %v91_v62 = vld [vmem:[#allocation14 + $0x68] sm:$0xff] }
  0x5a   :  { %528 = vmatprep.subr.bf16.mxu0 %v1583_v57  ;;  %v1591_v63 = vcombine.high %v86_v54, %v90_v61  ;;  %v1593_v48 = vcombine.high %v87_v53, %v91_v62  ;;  %v94_v0 = vld [vmem:[#allocation14 + $0x80] sm:$0xff]  ;;  %v95_v1 = vld [vmem:[#allocation14 + $0x88] sm:$0xff]  ;;  %601 = vmatprep.subr.bf16.mxu1 %v1585_v60  ;;  %v1590_v2 = vcombine.low %v86_v54, %v90_v61 }
  0x5b   :  { %v98_v50 = vld [vmem:[#allocation14 + $0xa0] sm:$0xff]  ;;  %529 = vmatpush1.bf16.msra.mxu0 %v1582_v59  ;;  %v99_v47 = vld [vmem:[#allocation14 + $0xa8] sm:$0xff]  ;;  %602 = vmatpush1.bf16.msra.mxu1 %v1584_v51  ;;  %v1592_v49 = vcombine.low %v87_v53, %v91_v62 }
  0x5c   :  { %530 = vmatprep.subr.bf16.mxu0 %v1591_v63  ;;  %v1599_v55 = vcombine.high %v94_v0, %v98_v50  ;;  %603 = vmatprep.subr.bf16.mxu1 %v1593_v48  ;;  %v1601_v56 = vcombine.high %v95_v1, %v99_v47  ;;  %v102_v52 = vld [vmem:[#allocation14 + $0xc0] sm:$0xff]  ;;  %v103_v44 = vld [vmem:[#allocation14 + $0xc8] sm:$0xff]  ;;  %v1598_v57 = vcombine.low %v94_v0, %v98_v50 }
  0x5d   :  { %v106_v58 = vld [vmem:[#allocation14 + $0xe0] sm:$0xff]  ;;  %v107_v46 = vld [vmem:[#allocation14 + $0xe8] sm:$0xff]  ;;  %v1600_v43 = vcombine.low %v95_v1, %v99_v47 }
  0x5e   :  { %v1607_v45 = vcombine.high %v102_v52, %v106_v58  ;;  %v1609_v59 = vcombine.high %v103_v44, %v107_v46  ;;  %v110_v54 = vld [vmem:[#allocation14 + $0x100] sm:$0xff]  ;;  %v111_v51 = vld [vmem:[#allocation14 + $0x108] sm:$0xff]  ;;  %v1606_v53 = vcombine.low %v102_v52, %v106_v58  ;;  %v1608_v48 = vcombine.low %v103_v44, %v107_v46 }
  0x5f   :  { %531 = vmatpush1.bf16.msra.mxu0 %v1590_v2  ;;  %604 = vmatpush1.bf16.msra.mxu1 %v1592_v49  ;;  %v114_v60 = vld [vmem:[#allocation14 + $0x120] sm:$0xff]  ;;  %v115_v61 = vld [vmem:[#allocation14 + $0x128] sm:$0xff] }
  0x60   :  { %532 = vmatprep.subr.bf16.mxu0 %v1599_v55  ;;  %605 = vmatprep.subr.bf16.mxu1 %v1601_v56  ;;  %v1615_v62 = vcombine.high %v110_v54, %v114_v60  ;;  %v1617_v63 = vcombine.high %v111_v51, %v115_v61  ;;  %v118_v2 = vld [vmem:[#allocation14 + $0x140] sm:$0xff]  ;;  %v119_v49 = vld [vmem:[#allocation14 + $0x148] sm:$0xff]  ;;  %v1614_v47 = vcombine.low %v110_v54, %v114_v60 }
  0x61   :  { %v122_v50 = vld [vmem:[#allocation14 + $0x160] sm:$0xff]  ;;  %v123_v0 = vld [vmem:[#allocation14 + $0x168] sm:$0xff]  ;;  %v1616_v1 = vcombine.low %v111_v51, %v115_v61 }
  0x62   :  { %v1623_v55 = vcombine.high %v118_v2, %v122_v50  ;;  %v126_v56 = vld [vmem:[#allocation14 + $0x180] sm:$0xff]  ;;  %v1622_v44 = vcombine.low %v118_v2, %v122_v50  ;;  %v1624_v46 = vcombine.low %v119_v49, %v123_v0  ;;  %v135_v60 = vld [vmem:[#allocation14 + $0x1c8] sm:$0xff]  ;;  %v80_v50 = vld [vmem:[#allocation14 + $0x10] sm:$0xff] }
  0x63   :  { %533 = vmatpush1.bf16.msra.mxu0 %v1598_v57  ;;  %606 = vmatpush1.bf16.msra.mxu1 %v1600_v43  ;;  %v1625_v57 = vcombine.high %v119_v49, %v123_v0  ;;  %v130_v52 = vld [vmem:[#allocation14 + $0x1a0] sm:$0xff]  ;;  %v127_v43 = vld [vmem:[#allocation14 + $0x188] sm:$0xff]  ;;  %v84_v49 = vld [vmem:[#allocation14 + $0x30] sm:$0xff] }
  0x64   :  { %534 = vmatprep.subr.bf16.mxu0 %v1607_v45  ;;  %607 = vmatprep.subr.bf16.mxu1 %v1609_v59  ;;  %v131_v45 = vld [vmem:[#allocation14 + $0x1a8] sm:$0xff]  ;;  %v1631_v58 = vcombine.high %v126_v56, %v130_v52  ;;  %v134_v59 = vld [vmem:[#allocation14 + $0x1c0] sm:$0xff]  ;;  %v1630_v51 = vcombine.low %v126_v56, %v130_v52  ;;  %v81_v0 = vld [vmem:[#allocation14 + $0x18] sm:$0xff]  ;;  %v1587_v56 = vcombine.high %v80_v50, %v84_v49 }
  0x65   :  { %v138_v54 = vld [vmem:[#allocation14 + $0x1e0] sm:$0xff]  ;;  %v1632_v61 = vcombine.low %v127_v43, %v131_v45  ;;  %v88_v52 = vld [vmem:[#allocation14 + $0x50] sm:$0xff] }
  0x67   :  { %535 = vmatpush1.bf16.msra.mxu0 %v1606_v53  ;;  %608 = vmatpush1.bf16.msra.mxu1 %v1608_v48  ;;  %v1633_v53 = vcombine.high %v127_v43, %v131_v45  ;;  %v139_v48 = vld [vmem:[#allocation14 + $0x1e8] sm:$0xff]  ;;  %v92_v43 = vld [vmem:[#allocation14 + $0x70] sm:$0xff]  ;;  %v2106_v45 = vld [vmem:[#allocation11] sm:$0xff]  }
  0x68   :  { %536 = vmatprep.subr.bf16.mxu0 %v1615_v62  ;;  %609 = vmatprep.subr.bf16.mxu1 %v1617_v63  ;;  %v1639_v62 = vcombine.high %v134_v59, %v138_v54  ;;  %v66_v63 = vld [vmem:[%s2428_s1] sm:$0xff]  ;;  %v1641_v2 = vcombine.high %v135_v60, %v139_v48 }
  0x69   :  { %68 = vperm.xlu0 %1748, %v66_v63   ;;  %v1595_v63 = vcombine.high %v88_v52, %v92_v43 }
  0x6b   :  { %537 = vmatpush1.bf16.msra.mxu0 %v1614_v47  ;;  %610 = vmatpush1.bf16.msra.mxu1 %v1616_v1  ;;  %v85_v47 = vld [vmem:[#allocation14 + $0x38] sm:$0xff]  ;;  %v1638_v1 = vcombine.low %v134_v59, %v138_v54  ;;  %v96_v54 = vld [vmem:[#allocation14 + $0x90] sm:$0xff] }
  0x6c   :  { %538 = vmatprep.subr.bf16.mxu0 %v1623_v55  ;;  %611 = vmatprep.subr.bf16.mxu1 %v1625_v57  ;;  %v1640_v55 = vcombine.low %v135_v60, %v139_v48  ;;  %v1589_v57 = vcombine.high %v81_v0, %v85_v47  ;;  %v97_v60 = vld [vmem:[#allocation14 + $0x98] sm:$0xff] }
  0x6d   :  { %v101_v48 = vld [vmem:[#allocation14 + $0xb8] sm:$0xff] }
  0x6f   :  { %539 = vmatpush1.bf16.msra.mxu0 %v1622_v44  ;;  %612 = vmatpush1.bf16.msra.mxu1 %v1624_v46  ;;  %v89_v44 = vld [vmem:[#allocation14 + $0x58] sm:$0xff] }
  0x70   :  { %540 = vmatprep.subr.bf16.mxu0 %v1631_v58  ;;  %613 = vmatprep.subr.bf16.mxu1 %v1633_v53  ;;  %v93_v46 = vld [vmem:[#allocation14 + $0x78] sm:$0xff]  ;;  %v1586_v58 = vcombine.low %v80_v50, %v84_v49  ;;  %v1588_v53 = vcombine.low %v81_v0, %v85_v47  ;;  %v2536_v50 = vmov 0   ;;  %v1605_v49 = vcombine.high %v97_v60, %v101_v48  ;;  %v104_v0 = vld [vmem:[#allocation14 + $0xd0] sm:$0xff] }
  0x71   :  { %v1597_v59 = vcombine.high %v89_v44, %v93_v46  ;;  %v108_v47 = vld [vmem:[#allocation14 + $0xf0] sm:$0xff] }
  0x73   :  { %541 = vmatpush1.bf16.msra.mxu0 %v1630_v51  ;;  %614 = vmatpush1.bf16.msra.mxu1 %v1632_v61  ;;  %v100_v51 = vld [vmem:[#allocation14 + $0xb0] sm:$0xff]  ;;  %v1594_v61 = vcombine.low %v88_v52, %v92_v43  ;;  %v1604_v52 = vcombine.low %v97_v60, %v101_v48  ;;  %v1611_v43 = vcombine.high %v104_v0, %v108_v47 }
  0x74   :  { %542 = vmatprep.subr.bf16.mxu0 %v1639_v62  ;;  %615 = vmatprep.subr.bf16.mxu1 %v1641_v2  ;;  %v1596_v62 = vcombine.low %v89_v44, %v93_v46  ;;  %v1603_v2 = vcombine.high %v96_v54, %v100_v51  ;;  %v112_v46 = vld [vmem:[#allocation14 + $0x110] sm:$0xff] }
  0x75   :  { %v120_v60 = vld [vmem:[#allocation14 + $0x150] sm:$0xff] }
  0x76   :  { %v124_v48 = vld [vmem:[#allocation14 + $0x170] sm:$0xff] }
  0x77   :  { %543 = vmatpush1.bf16.msra.mxu0 %v1638_v1  ;;  %616 = vmatpush1.bf16.msra.mxu1 %v1640_v55  ;;  %v2112_v1 = vld [vmem:[#allocation11 + $0x8] sm:$0xff]   ;;  %v105_v55 = vld [vmem:[#allocation14 + $0xd8] sm:$0xff] }
  0x78   :  { %674 = vmatprep.subr.bf16.mxu0 %v1587_v56  ;;  %747 = vmatprep.subr.bf16.mxu1 %v1589_v57  ;;  %v109_v56 = vld [vmem:[#allocation14 + $0xf8] sm:$0xff]  ;;  %v1602_v57 = vcombine.low %v96_v54, %v100_v51 }
  0x79   :  { %v1613_v44 = vcombine.high %v105_v55, %v109_v56 }
  0x7a   :  { %561 = vmatmul.mubr.bf16.vlgmr.msra.gmra.mrb[0].mxu0 %v2106_v45  ;;  %634 = vmatmul.mubr.bf16.vlgmr.msra.gmra.mrb[0].mxu1 %v2106_v45 }
  0x7b   :  { %675 = vmatpush1.bf16.msra.mxu0 %v1586_v58  ;;  %748 = vmatpush1.bf16.msra.mxu1 %v1588_v53  ;;  %v116_v58 = vld [vmem:[#allocation14 + $0x130] sm:$0xff]  ;;  %v113_v53 = vld [vmem:[#allocation14 + $0x118] sm:$0xff] }
  0x7c   :  { %676 = vmatprep.subr.bf16.mxu0 %v1595_v63  ;;  %749 = vmatprep.subr.bf16.mxu1 %v1597_v59  ;;  %v117_v63 = vld [vmem:[#allocation14 + $0x138] sm:$0xff]  ;;  %v1610_v59 = vcombine.low %v104_v0, %v108_v47  ;;  %v1619_v54 = vcombine.high %v112_v46, %v116_v58  ;;  %v1618_v40 = vcombine.low %v112_v46, %v116_v58  ;;  %v136_v58 = vld [vmem:[#allocation14 + $0x1d0] sm:$0xff] }
  0x7d   :  { %570 = vmatprep.mubr.bf16.mxu0 %v2536_v50  ;;  %643 = vmatprep.mubr.bf16.mxu1 %v2536_v50  ;;  %v1621_v51 = vcombine.high %v113_v53, %v117_v63  ;;  %v1620_v0 = vcombine.low %v113_v53, %v117_v63  ;;  %v1627_v47 = vcombine.high %v120_v60, %v124_v48  ;;  %v140_v53 = vld [vmem:[#allocation14 + $0x1f0] sm:$0xff]  ;;  %v1752_v63 = vld [vmem:[#allocation11 + $0x18] sm:$0xff]  }
  0x7f   :  { %677 = vmatpush1.bf16.msra.mxu0 %v1594_v61  ;;  %750 = vmatpush1.bf16.msra.mxu1 %v1596_v62  ;;  %v1612_v61 = vcombine.low %v105_v55, %v109_v56  ;;  %v1751_v62 = vld [vmem:[#allocation11 + $0x10] sm:$0xff]  }
  0x80   :  { %678 = vmatprep.subr.bf16.mxu0 %v1603_v2  ;;  %751 = vmatprep.subr.bf16.mxu1 %v1605_v49  ;;  %v121_v2 = vld [vmem:[#allocation14 + $0x158] sm:$0xff]  ;;  %v128_v56 = vld [vmem:[#allocation14 + $0x190] sm:$0xff] }
  0x81   :  { %v125_v49 = vld [vmem:[#allocation14 + $0x178] sm:$0xff] }
  0x82   :  { %571 = vmatmul.mubr.bf16.gmra.mrb[4].mxu0 %v2112_v1  ;;  %644 = vmatmul.mubr.bf16.gmra.mrb[4].mxu1 %v2112_v1  ;;  %v1629_v55 = vcombine.high %v121_v2, %v125_v49  ;;  %v1628_v42 = vcombine.low %v121_v2, %v125_v49 }
  0x83   :  { %679 = vmatpush1.bf16.msra.mxu0 %v1602_v57  ;;  %752 = vmatpush1.bf16.msra.mxu1 %v1604_v52  ;;  %v132_v57 = vld [vmem:[#allocation14 + $0x1b0] sm:$0xff]  ;;  %v129_v52 = vld [vmem:[#allocation14 + $0x198] sm:$0xff] }
  0x84   :  { %680 = vmatprep.subr.bf16.mxu0 %v1611_v43  ;;  %753 = vmatprep.subr.bf16.mxu1 %v1613_v44  ;;  %v133_v43 = vld [vmem:[#allocation14 + $0x1b8] sm:$0xff]  ;;  %v1626_v44 = vcombine.low %v120_v60, %v124_v48  ;;  %v1635_v39 = vcombine.high %v128_v56, %v132_v57  ;;  %v1642_v48 = vcombine.low %v136_v58, %v140_v53 }
  0x85   :  { %580 = vmatprep.mubr.bf16.mxu0 %v2536_v50  ;;  %653 = vmatprep.mubr.bf16.mxu1 %v2536_v50  ;;  %v1637_v46 = vcombine.high %v129_v52, %v133_v43 }
  0x87   :  { %681 = vmatpush1.bf16.msra.mxu0 %v1610_v59  ;;  %754 = vmatpush1.bf16.msra.mxu1 %v1612_v61  ;;  %v137_v59 = vld [vmem:[#allocation14 + $0x1d8] sm:$0xff] }
  0x88   :  { %682 = vmatprep.subr.bf16.mxu0 %v1619_v54  ;;  %755 = vmatprep.subr.bf16.mxu1 %v1621_v51  ;;  %v141_v61 = vld [vmem:[#allocation14 + $0x1f8] sm:$0xff]  ;;  %v1634_v54 = vcombine.low %v128_v56, %v132_v57  ;;  %v1643_v51 = vcombine.high %v136_v58, %v140_v53 }
  0x89   :  { %v1645_v60 = vcombine.high %v137_v59, %v141_v61  ;;  %v1644_v2 = vcombine.low %v137_v59, %v141_v61 }
  0x8a   :  { %581 = vmatmul.mubr.bf16.gmra.mrb[8].mxu0 %v1751_v62  ;;  %654 = vmatmul.mubr.bf16.gmra.mrb[8].mxu1 %v1751_v62 }
  0x8b   :  { %683 = vmatpush1.bf16.msra.mxu0 %v1618_v40  ;;  %756 = vmatpush1.bf16.msra.mxu1 %v1620_v0  ;;  %v1636_v40 = vcombine.low %v129_v52, %v133_v43 }
  0x8c   :  { %684 = vmatprep.subr.bf16.mxu0 %v1627_v47  ;;  %757 = vmatprep.subr.bf16.mxu1 %v1629_v55 }
  0x8d   :  { %590 = vmatprep.mubr.bf16.mxu0 %v2536_v50  ;;  %663 = vmatprep.mubr.bf16.mxu1 %v2536_v50 }
  0x8f   :  { %685 = vmatpush1.bf16.msra.mxu0 %v1626_v44  ;;  %758 = vmatpush1.bf16.msra.mxu1 %v1628_v42  ;;  %v144_v42 = vlaneseq }
  0x90   :  { %686 = vmatprep.subr.bf16.mxu0 %v1635_v39  ;;  %759 = vmatprep.subr.bf16.mxu1 %v1637_v46 }
  0x92   :  { %591 = vmatmul.mubr.bf16.gmra.mrb[12].mxu0 %v1752_v63  ;;  %664 = vmatmul.mubr.bf16.gmra.mrb[12].mxu1 %v1752_v63 }
  0x93   :  { %687 = vmatpush1.bf16.msra.mxu0 %v1634_v54  ;;  %760 = vmatpush1.bf16.msra.mxu1 %v1636_v40 }
  0x94   :  { %688 = vmatprep.subr.bf16.mxu0 %v1643_v51  ;;  %761 = vmatprep.subr.bf16.mxu1 %v1645_v60 }
  0x95   :  { %706 = vmatprep.mubr.bf16.mxu0 %v2536_v50  ;;  %779 = vmatprep.mubr.bf16.mxu1 %v2536_v50 }
  0x97   :  { %689 = vmatpush1.bf16.msra.mxu0 %v1642_v48  ;;  %762 = vmatpush1.bf16.msra.mxu1 %v1644_v2 }
  0x9a   :  { %707 = vmatmul.mubr.bf16.vlgmr.msra.gmra.mrb[16].mxu0 %v2106_v45  ;;  %780 = vmatmul.mubr.bf16.vlgmr.msra.gmra.mrb[16].mxu1 %v2106_v45  ;;  %v2134_v45 = vshrl.u32 %v144_v42, 7 }
  0x9b   :  { %716 = vmatprep.mubr.bf16.mxu0 %v2536_v50  ;;  %789 = vmatprep.mubr.bf16.mxu1 %v2536_v50 }
  0x9c   :  { %v146_v49 = vsub.s32 0, %v2134_v45  ;;  %v150_v0 = vsub.s32 1, %v2134_v45 }
  0xa2   :  { %717 = vmatmul.mubr.bf16.gmra.mrb[20].mxu0 %v2112_v1  ;;  %790 = vmatmul.mubr.bf16.gmra.mrb[20].mxu1 %v2112_v1  ;;  %v2140_v1 = vld [vmem:[%s2432_s5] sm:$0xff] }
  0xa3   :  { %726 = vmatprep.mubr.bf16.mxu0 %v2536_v50  ;;  %799 = vmatprep.mubr.bf16.mxu1 %v2536_v50  ;;  %v2146_v47 = vrot.slane %v2140_v1, %v146_v49  ;;  %v2152_v56 = vrot.slane %v2140_v1, %v150_v0 }
  0xaa   :  { %727 = vmatmul.mubr.bf16.gmra.mrb[24].mxu0 %v1751_v62  ;;  %800 = vmatmul.mubr.bf16.gmra.mrb[24].mxu1 %v1751_v62  ;;  %v154_v62 = vsub.s32 2, %v2134_v45 }
  0xab   :  { %736 = vmatprep.mubr.bf16.mxu0 %v2536_v50  ;;  %809 = vmatprep.mubr.bf16.mxu1 %v2536_v50  ;;  %v158_v50 = vsub.s32 3, %v2134_v45 }
  0xac   :  { %v2149_v55 = vrot.slane %v2140_v1, %v154_v62 }
  0xad   :  { %v2155_v57 = vrot.slane %v2140_v1, %v158_v50 }
  0xb2   :  { %737 = vmatmul.mubr.bf16.gmra.mrb[28].mxu0 %v1752_v63  ;;  %810 = vmatmul.mubr.bf16.gmra.mrb[28].mxu1 %v1752_v63 }
  0xe8   :  { %v2132_v39 = vpop.permute.xlu0 %68 }
 0x14d   :  { %v562_v52 = vpop.f32.mrb[0].mxu0  ;;  %v635_v44 = vpop.f32.mrb[0].mxu1 }
 0x14e   :  { %v563_v43 = vadd.f32 %v562_v52, %v2146_v47  ;;  %v564_v46 = vpop.f32.mrb[1].mxu0  ;;  %v636_v58 = vadd.f32 %v635_v44, %v2149_v55  ;;  %v637_v63 = vpop.f32.mrb[1].mxu1 }
 0x14f   :  { %v565_v53 = vadd.f32 %v564_v46, %v2152_v56  ;;  %v566_v59 = vpop.f32.mrb[2].mxu0  ;;  %v638_v61 = vadd.f32 %v637_v63, %v2155_v57  ;;  %v639_v40 = vpop.f32.mrb[2].mxu1 }
 0x150   :  { %820 = vst [vmem:[#allocation2] sm:$0xff] %v563_v43  ;;  %v567_v54 = vadd.f32 %v566_v59, %v2146_v47  ;;  %v568_v51 = vpop.f32.mrb[3].mxu0  ;;  %822 = vst [vmem:[#allocation2 + $0x10] sm:$0xff] %v636_v58  ;;  %v640_v60 = vadd.f32 %v639_v40, %v2149_v55  ;;  %v641_v2 = vpop.f32.mrb[3].mxu1 }
 0x151   :  { %821 = vst [vmem:[#allocation2 + $0x8] sm:$0xff] %v565_v53  ;;  %v569_v48 = vadd.f32 %v568_v51, %v2152_v56  ;;  %823 = vst [vmem:[#allocation2 + $0x18] sm:$0xff] %v638_v61  ;;  %v642_v42 = vadd.f32 %v641_v2, %v2155_v57 }
 0x152   :  { %828 = vst [vmem:[#allocation2 + $0x40] sm:$0xff] %v567_v54  ;;  %830 = vst [vmem:[#allocation2 + $0x50] sm:$0xff] %v640_v60 }
 0x153   :  { %829 = vst [vmem:[#allocation2 + $0x48] sm:$0xff] %v569_v48  ;;  %831 = vst [vmem:[#allocation2 + $0x58] sm:$0xff] %v642_v42 }
 0x155   :  { %v572_v49 = vpop.f32.mrb[4].mxu0  ;;  %v645_v0 = vpop.f32.mrb[4].mxu1 }
 0x156   :  { %v573_v62 = vadd.f32 %v572_v49, %v2146_v47  ;;  %v574_v50 = vpop.f32.mrb[5].mxu0  ;;  %v646_v52 = vadd.f32 %v645_v0, %v2149_v55  ;;  %v647_v44 = vpop.f32.mrb[5].mxu1 }
 0x157   :  { %v575_v43 = vadd.f32 %v574_v50, %v2152_v56  ;;  %v576_v46 = vpop.f32.mrb[6].mxu0  ;;  %v648_v58 = vadd.f32 %v647_v44, %v2155_v57  ;;  %v649_v63 = vpop.f32.mrb[6].mxu1 }
 0x158   :  { %836 = vst [vmem:[#allocation2 + $0x80] sm:$0xff] %v573_v62  ;;  %v577_v53 = vadd.f32 %v576_v46, %v2146_v47  ;;  %v578_v59 = vpop.f32.mrb[7].mxu0  ;;  %838 = vst [vmem:[#allocation2 + $0x90] sm:$0xff] %v646_v52  ;;  %v650_v61 = vadd.f32 %v649_v63, %v2149_v55  ;;  %v651_v40 = vpop.f32.mrb[7].mxu1 }
 0x159   :  { %837 = vst [vmem:[#allocation2 + $0x88] sm:$0xff] %v575_v43  ;;  %v579_v54 = vadd.f32 %v578_v59, %v2152_v56  ;;  %839 = vst [vmem:[#allocation2 + $0x98] sm:$0xff] %v648_v58  ;;  %v652_v51 = vadd.f32 %v651_v40, %v2155_v57 }
 0x15a   :  { %844 = vst [vmem:[#allocation2 + $0xc0] sm:$0xff] %v577_v53  ;;  %846 = vst [vmem:[#allocation2 + $0xd0] sm:$0xff] %v650_v61 }
 0x15b   :  { %845 = vst [vmem:[#allocation2 + $0xc8] sm:$0xff] %v579_v54  ;;  %847 = vst [vmem:[#allocation2 + $0xd8] sm:$0xff] %v652_v51 }
 0x15d   :  { %v582_v60 = vpop.f32.mrb[8].mxu0  ;;  %v655_v2 = vpop.f32.mrb[8].mxu1 }
 0x15e   :  { %v583_v48 = vadd.f32 %v582_v60, %v2146_v47  ;;  %v584_v42 = vpop.f32.mrb[9].mxu0  ;;  %v656_v49 = vadd.f32 %v655_v2, %v2149_v55  ;;  %v657_v0 = vpop.f32.mrb[9].mxu1  ;;  %v162_v60 = vsub.s32 4, %v2134_v45 }
 0x15f   :  { %v585_v62 = vadd.f32 %v584_v42, %v2152_v56  ;;  %v586_v50 = vpop.f32.mrb[10].mxu0  ;;  %v658_v52 = vadd.f32 %v657_v0, %v2155_v57  ;;  %v659_v44 = vpop.f32.mrb[10].mxu1  ;;  %v166_v0 = vsub.s32 5, %v2134_v45 }
 0x160   :  { %852 = vst [vmem:[#allocation2 + $0x100] sm:$0xff] %v583_v48  ;;  %v587_v43 = vadd.f32 %v586_v50, %v2146_v47  ;;  %v588_v46 = vpop.f32.mrb[11].mxu0  ;;  %854 = vst [vmem:[#allocation2 + $0x110] sm:$0xff] %v656_v49  ;;  %v660_v58 = vadd.f32 %v659_v44, %v2149_v55  ;;  %v661_v63 = vpop.f32.mrb[11].mxu1 }
 0x161   :  { %853 = vst [vmem:[#allocation2 + $0x108] sm:$0xff] %v585_v62  ;;  %v589_v53 = vadd.f32 %v588_v46, %v2152_v56  ;;  %855 = vst [vmem:[#allocation2 + $0x118] sm:$0xff] %v658_v52  ;;  %v662_v59 = vadd.f32 %v661_v63, %v2155_v57  ;;  %v170_v62 = vsub.s32 6, %v2134_v45  ;;  %v174_v46 = vsub.s32 7, %v2134_v45 }
 0x162   :  { %860 = vst [vmem:[#allocation2 + $0x140] sm:$0xff] %v587_v43  ;;  %862 = vst [vmem:[#allocation2 + $0x150] sm:$0xff] %v660_v58  ;;  %v2200_v45 = vrot.slane %v2140_v1, %v166_v0 }
 0x163   :  { %861 = vst [vmem:[#allocation2 + $0x148] sm:$0xff] %v589_v53  ;;  %863 = vst [vmem:[#allocation2 + $0x158] sm:$0xff] %v662_v59 }
 0x165   :  { %v592_v61 = vpop.f32.mrb[12].mxu0  ;;  %v665_v40 = vpop.f32.mrb[12].mxu1 }
 0x166   :  { %v593_v54 = vadd.f32 %v592_v61, %v2146_v47  ;;  %v594_v51 = vpop.f32.mrb[13].mxu0  ;;  %v666_v48 = vadd.f32 %v665_v40, %v2149_v55  ;;  %v667_v42 = vpop.f32.mrb[13].mxu1  ;;  %v2194_v61 = vrot.slane %v2140_v1, %v162_v60 }
 0x167   :  { %v595_v2 = vadd.f32 %v594_v51, %v2152_v56  ;;  %v596_v49 = vpop.f32.mrb[14].mxu0  ;;  %v668_v50 = vadd.f32 %v667_v42, %v2155_v57  ;;  %v669_v43 = vpop.f32.mrb[14].mxu1 }
 0x168   :  { %868 = vst [vmem:[#allocation2 + $0x180] sm:$0xff] %v593_v54  ;;  %v597_v52 = vadd.f32 %v596_v49, %v2146_v47  ;;  %v598_v44 = vpop.f32.mrb[15].mxu0  ;;  %870 = vst [vmem:[#allocation2 + $0x190] sm:$0xff] %v666_v48  ;;  %v670_v58 = vadd.f32 %v669_v43, %v2149_v55  ;;  %v671_v63 = vpop.f32.mrb[15].mxu1  ;;  %v2197_v47 = vrot.slane %v2140_v1, %v170_v62 }
 0x169   :  { %869 = vst [vmem:[#allocation2 + $0x188] sm:$0xff] %v595_v2  ;;  %v599_v53 = vadd.f32 %v598_v44, %v2152_v56  ;;  %871 = vst [vmem:[#allocation2 + $0x198] sm:$0xff] %v668_v50  ;;  %v672_v59 = vadd.f32 %v671_v63, %v2155_v57  ;;  %v2203_v55 = vrot.slane %v2140_v1, %v174_v46 }
 0x16a   :  { %876 = vst [vmem:[#allocation2 + $0x1c0] sm:$0xff] %v597_v52  ;;  %878 = vst [vmem:[#allocation2 + $0x1d0] sm:$0xff] %v670_v58 }
 0x16b   :  { %877 = vst [vmem:[#allocation2 + $0x1c8] sm:$0xff] %v599_v53  ;;  %879 = vst [vmem:[#allocation2 + $0x1d8] sm:$0xff] %v672_v59 }
 0x16d   :  { %v708_v56 = vpop.f32.mrb[16].mxu0  ;;  %v781_v40 = vpop.f32.mrb[16].mxu1 }
 0x16e   :  { %v709_v54 = vadd.f32 %v708_v56, %v2194_v61  ;;  %v710_v57 = vpop.f32.mrb[17].mxu0  ;;  %v782_v51 = vadd.f32 %v781_v40, %v2197_v47  ;;  %v783_v48 = vpop.f32.mrb[17].mxu1 }
 0x16f   :  { %v711_v60 = vadd.f32 %v710_v57, %v2200_v45  ;;  %v712_v2 = vpop.f32.mrb[18].mxu0  ;;  %v784_v42 = vadd.f32 %v783_v48, %v2203_v55  ;;  %v785_v62 = vpop.f32.mrb[18].mxu1 }
 0x170   :  { %824 = vst [vmem:[#allocation2 + $0x20] sm:$0xff] %v709_v54  ;;  %v713_v49 = vadd.f32 %v712_v2, %v2194_v61  ;;  %v714_v0 = vpop.f32.mrb[19].mxu0  ;;  %826 = vst [vmem:[#allocation2 + $0x30] sm:$0xff] %v782_v51  ;;  %v786_v1 = vadd.f32 %v785_v62, %v2197_v47  ;;  %v787_v52 = vpop.f32.mrb[19].mxu1 }
 0x171   :  { %825 = vst [vmem:[#allocation2 + $0x28] sm:$0xff] %v711_v60  ;;  %v715_v50 = vadd.f32 %v714_v0, %v2200_v45  ;;  %827 = vst [vmem:[#allocation2 + $0x38] sm:$0xff] %v784_v42  ;;  %v788_v43 = vadd.f32 %v787_v52, %v2203_v55 }
 0x172   :  { %832 = vst [vmem:[#allocation2 + $0x60] sm:$0xff] %v713_v49  ;;  %834 = vst [vmem:[#allocation2 + $0x70] sm:$0xff] %v786_v1 }
 0x173   :  { %833 = vst [vmem:[#allocation2 + $0x68] sm:$0xff] %v715_v50  ;;  %835 = vst [vmem:[#allocation2 + $0x78] sm:$0xff] %v788_v43 }
 0x175   :  { %v718_v44 = vpop.f32.mrb[20].mxu0  ;;  %v791_v58 = vpop.f32.mrb[20].mxu1 }
 0x176   :  { %v719_v46 = vadd.f32 %v718_v44, %v2194_v61  ;;  %v720_v53 = vpop.f32.mrb[21].mxu0  ;;  %v792_v63 = vadd.f32 %v791_v58, %v2197_v47  ;;  %v793_v56 = vpop.f32.mrb[21].mxu1 }
 0x177   :  { %v721_v59 = vadd.f32 %v720_v53, %v2200_v45  ;;  %v722_v54 = vpop.f32.mrb[22].mxu0  ;;  %v794_v40 = vadd.f32 %v793_v56, %v2203_v55  ;;  %v795_v51 = vpop.f32.mrb[22].mxu1 }
 0x178   :  { %840 = vst [vmem:[#allocation2 + $0xa0] sm:$0xff] %v719_v46  ;;  %v723_v57 = vadd.f32 %v722_v54, %v2194_v61  ;;  %v724_v60 = vpop.f32.mrb[23].mxu0  ;;  %842 = vst [vmem:[#allocation2 + $0xb0] sm:$0xff] %v792_v63  ;;  %v796_v48 = vadd.f32 %v795_v51, %v2197_v47  ;;  %v797_v42 = vpop.f32.mrb[23].mxu1 }
 0x179   :  { %841 = vst [vmem:[#allocation2 + $0xa8] sm:$0xff] %v721_v59  ;;  %v725_v2 = vadd.f32 %v724_v60, %v2200_v45  ;;  %843 = vst [vmem:[#allocation2 + $0xb8] sm:$0xff] %v794_v40  ;;  %v798_v49 = vadd.f32 %v797_v42, %v2203_v55 }
 0x17a   :  { %848 = vst [vmem:[#allocation2 + $0xe0] sm:$0xff] %v723_v57  ;;  %850 = vst [vmem:[#allocation2 + $0xf0] sm:$0xff] %v796_v48 }
 0x17b   :  { %849 = vst [vmem:[#allocation2 + $0xe8] sm:$0xff] %v725_v2  ;;  %851 = vst [vmem:[#allocation2 + $0xf8] sm:$0xff] %v798_v49 }
 0x17d   :  { %v728_v62 = vpop.f32.mrb[24].mxu0  ;;  %v801_v1 = vpop.f32.mrb[24].mxu1 }
 0x17e   :  { %v729_v0 = vadd.f32 %v728_v62, %v2194_v61  ;;  %v730_v50 = vpop.f32.mrb[25].mxu0  ;;  %v802_v52 = vadd.f32 %v801_v1, %v2197_v47  ;;  %v803_v44 = vpop.f32.mrb[25].mxu1 }
 0x17f   :  { %v731_v43 = vadd.f32 %v730_v50, %v2200_v45  ;;  %v732_v46 = vpop.f32.mrb[26].mxu0  ;;  %v804_v58 = vadd.f32 %v803_v44, %v2203_v55  ;;  %v805_v63 = vpop.f32.mrb[26].mxu1 }
 0x180   :  { %856 = vst [vmem:[#allocation2 + $0x120] sm:$0xff] %v729_v0  ;;  %v733_v53 = vadd.f32 %v732_v46, %v2194_v61  ;;  %v734_v59 = vpop.f32.mrb[27].mxu0  ;;  %858 = vst [vmem:[#allocation2 + $0x130] sm:$0xff] %v802_v52  ;;  %v806_v56 = vadd.f32 %v805_v63, %v2197_v47  ;;  %v807_v40 = vpop.f32.mrb[27].mxu1 }
 0x181   :  { %857 = vst [vmem:[#allocation2 + $0x128] sm:$0xff] %v731_v43  ;;  %v735_v54 = vadd.f32 %v734_v59, %v2200_v45  ;;  %859 = vst [vmem:[#allocation2 + $0x138] sm:$0xff] %v804_v58  ;;  %v808_v57 = vadd.f32 %v807_v40, %v2203_v55 }
 0x182   :  { %864 = vst [vmem:[#allocation2 + $0x160] sm:$0xff] %v733_v53  ;;  %866 = vst [vmem:[#allocation2 + $0x170] sm:$0xff] %v806_v56 }
 0x183   :  { %865 = vst [vmem:[#allocation2 + $0x168] sm:$0xff] %v735_v54  ;;  %867 = vst [vmem:[#allocation2 + $0x178] sm:$0xff] %v808_v57 }
 0x185   :  { %v738_v51 = vpop.f32.mrb[28].mxu0  ;;  %v811_v48 = vpop.f32.mrb[28].mxu1  ;;  %1575 = sbr.rel (%p1646_p10) target bundleno = 731 (0x2db), region = 56 }
 0x186   :  { %v739_v60 = vadd.f32 %v738_v51, %v2194_v61  ;;  %v740_v2 = vpop.f32.mrb[29].mxu0  ;;  %v812_v42 = vadd.f32 %v811_v48, %v2197_v47  ;;  %v813_v62 = vpop.f32.mrb[29].mxu1 }
 0x187   :  { %v741_v49 = vadd.f32 %v740_v2, %v2200_v45  ;;  %v742_v0 = vpop.f32.mrb[30].mxu0  ;;  %v814_v1 = vadd.f32 %v813_v62, %v2203_v55  ;;  %v815_v52 = vpop.f32.mrb[30].mxu1 }
 0x188   :  { %872 = vst [vmem:[#allocation2 + $0x1a0] sm:$0xff] %v739_v60  ;;  %v743_v50 = vadd.f32 %v742_v0, %v2194_v61  ;;  %v744_v43 = vpop.f32.mrb[31].mxu0  ;;  %874 = vst [vmem:[#allocation2 + $0x1b0] sm:$0xff] %v812_v42  ;;  %v816_v44 = vadd.f32 %v815_v52, %v2197_v47  ;;  %v817_v58 = vpop.f32.mrb[31].mxu1 }
 0x189   :  { %873 = vst [vmem:[#allocation2 + $0x1a8] sm:$0xff] %v741_v49  ;;  %v745_v46 = vadd.f32 %v744_v43, %v2200_v45  ;;  %875 = vst [vmem:[#allocation2 + $0x1b8] sm:$0xff] %v814_v1  ;;  %v818_v53 = vadd.f32 %v817_v58, %v2203_v55 }
 0x18a   :  { %880 = vst [vmem:[#allocation2 + $0x1e0] sm:$0xff] %v743_v50  ;;  %882 = vst [vmem:[#allocation2 + $0x1f0] sm:$0xff] %v816_v44 }
 0x18b   :  { %881 = vst [vmem:[#allocation2 + $0x1e8] sm:$0xff] %v745_v46  ;;  %883 = vst [vmem:[#allocation2 + $0x1f8] sm:$0xff] %v818_v53 }
 0x18c LB: > { %v2537_v21 = vld [vmem:[#allocation39_spill] sm:$0xff]  ;;  %v2538_v20 = vld [vmem:[#allocation38_spill] sm:$0xff]  ;;  %v2539_v19 = vld [vmem:[#allocation37_spill] sm:$0xff]  ;;  %v1899_v51 = vmov 0   ;;  %v1673_v52 = vcombine.high %v2015_v23, %v2019_v25  ;;  %v1675_v44 = vcombine.high %v2017_v24, %v2021_v26  ;;  %v1672_v46 = vcombine.low %v2015_v23, %v2019_v25  ;;  %s1648_s17 = sshll.u32 %s1885_s16, 3  ;;  %s1647_s22 = sadd.s32 4294967295, %s2427_s0  ;;  %s1885_s16 = sphi %s2240_s16, %s958_s16  }
 0x18d   : > { %v2540_v18 = vld [vmem:[#allocation36_spill] sm:$0xff]  ;;  %v2541_v17 = vld [vmem:[#allocation35_spill] sm:$0xff]  ;;  %v2542_v16 = vld [vmem:[#allocation34_spill] sm:$0xff]  ;;  %1171 = vmatprep.mubr.bf16.mxu0 %v1899_v51  ;;  %1212 = vmatprep.mubr.bf16.mxu1 %v1899_v51  ;;  %v1669_v62 = vcombine.high %v2539_v19, %v2537_v21  ;;  %v1671_v1 = vcombine.high %v2538_v20, %v2013_v22  ;;  %v1668_v50 = vcombine.low %v2539_v19, %v2537_v21  ;;  %s969_s18 = sshra.s32 %s1648_s17, 3  ;;  %s2390_s23 = ssub.s32 %s1647_s22, %s1885_s16 }
 0x18e   : > { %v2543_v15 = vld [vmem:[#allocation33_spill] sm:$0xff]  ;;  %v2544_v14 = vld [vmem:[#allocation32_spill] sm:$0xff]  ;;  %v2545_v13 = vld [vmem:[#allocation31_spill] sm:$0xff]  ;;  %v1667_v42 = vcombine.high %v2542_v16, %v2540_v18  ;;  %v1666_v0 = vcombine.low %v2542_v16, %v2540_v18  ;;  %v1670_v43 = vcombine.low %v2538_v20, %v2013_v22  ;;  %v1677_v58 = vcombine.high %v2023_v27, %v2027_v29  ;;  %s1724_s19 = sshll.u32 %s969_s18, 6  ;;  %s1649_s24 = sshll.u32 %s2390_s23, 3 }
 0x18f   : > { %v2546_v12 = vld [vmem:[#allocation30_spill] sm:$0xff]  ;;  %v2547_v11 = vld [vmem:[#allocation29_spill] sm:$0xff]  ;;  %v2548_v10 = vld [vmem:[#allocation28_spill] sm:$0xff]  ;;  %v1665_v48 = vcombine.high %v2543_v15, %v2541_v17  ;;  %v1664_v49 = vcombine.low %v2543_v15, %v2541_v17  ;;  %v1674_v53 = vcombine.low %v2017_v24, %v2021_v26  ;;  %s973_s20 = scalar_lea.vmem [#allocation2], %s1724_s19  ;;  %s1225_s25 = sshra.s32 %s1649_s24, 3 }
 0x190   : > { %v2549_v9 = vld [vmem:[#allocation27_spill] sm:$0xff]  ;;  %v2550_v8 = vld [vmem:[#allocation26_spill] sm:$0xff]  ;;  %v2551_v7 = vld [vmem:[#allocation25_spill] sm:$0xff]  ;;  %v1661_v54 = vcombine.high %v2547_v11, %v2545_v13  ;;  %v1663_v57 = vcombine.high %v2546_v12, %v2544_v14  ;;  %v1660_v60 = vcombine.low %v2547_v11, %v2545_v13  ;;  %v1662_v2 = vcombine.low %v2546_v12, %v2544_v14  ;;  %s1725_s26 = sshll.u32 %s1225_s25, 6 }
 0x191   : > { %v2552_v6 = vld [vmem:[#allocation24_spill] sm:$0xff]  ;;  %v2553_v5 = vld [vmem:[#allocation23_spill] sm:$0xff]  ;;  %v2554_v4 = vld [vmem:[#allocation22_spill] sm:$0xff]  ;;  %v1657_v45 = vcombine.high %v2551_v7, %v2549_v9  ;;  %v1659_v59 = vcombine.high %v2550_v8, %v2548_v10  ;;  %v1656_v56 = vcombine.low %v2551_v7, %v2549_v9  ;;  %v1658_v40 = vcombine.low %v2550_v8, %v2548_v10  ;;  %s1229_s27 = scalar_lea.vmem [#allocation2], %s1725_s26 }
 0x192   : > { %v2555_v3 = vld [vmem:[#allocation21_spill] sm:$0xff]  ;;  %v1655_v55 = vcombine.high %v2554_v4, %v2552_v6  ;;  %v1654_v63 = vcombine.low %v2554_v4, %v2552_v6  ;;  %v2576_v4 = vld [vmem:[#allocation59_spill] sm:$0xff]  ;;  %v2578_v6 = vld [vmem:[#allocation60_spill] sm:$0xff] }
 0x193   : > { %v1653_v61 = vcombine.high %v2555_v3, %v2553_v5  ;;  %v1652_v47 = vcombine.low %v2555_v3, %v2553_v5  ;;  %v2580_v7 = vld [vmem:[#allocation63_spill] sm:$0xff]  ;;  %v977_v12 = vld [vmem:[%s973_s20 + $0x18] sm:$0xff] }
 0x194   : > { %1180 = vmatprep.subr.bf16.mxu1 %v1655_v55  ;;  %v1678_v55 = vcombine.low %v2025_v28, %v2029_v30  ;;  %v2379_v9 = vld [vmem:[#allocation5] sm:$0xff]  ;;  %v1233_v18 = vld [vmem:[%s1229_s27 + $0x38] sm:$0xff] }
 0x195   : > { %1139 = vmatprep.subr.bf16.mxu0 %v1653_v61  ;;  %1181 = vmatpush1.bf16.msra.mxu1 %v1654_v63  ;;  %v1679_v61 = vcombine.high %v2025_v28, %v2029_v30  ;;  %v1683_v63 = vcombine.high %v2033_v32, %v2037_v34  ;;  %v976_v14 = vld [vmem:[%s973_s20 + $0x10] sm:$0xff] }
 0x196   : > { %1140 = vmatpush1.bf16.msra.mxu0 %v1652_v47  ;;  %1182 = vmatprep.subr.bf16.mxu1 %v1659_v59  ;;  %v1676_v47 = vcombine.low %v2023_v27, %v2027_v29  ;;  %v1680_v59 = vcombine.low %v2031_v31, %v2035_v33 }
 0x197   : > { %1141 = vmatprep.subr.bf16.mxu0 %v1657_v45  ;;  %v1681_v45 = vcombine.high %v2031_v31, %v2035_v33 }
 0x199   : > { %1183 = vmatpush1.bf16.msra.mxu1 %v1658_v40  ;;  %v1682_v40 = vcombine.low %v2033_v32, %v2037_v34 }
 0x19a   : > { %1142 = vmatpush1.bf16.msra.mxu0 %v1656_v56  ;;  %1184 = vmatprep.subr.bf16.mxu1 %v1663_v57  ;;  %v2309_v56 = vld [vmem:[#allocation3] sm:$0xff]  ;;  %v1689_v57 = vcombine.high %v2041_v36, %v2045_v38 }
 0x19b   : > { %1143 = vmatprep.subr.bf16.mxu0 %v1661_v54  ;;  %v1687_v54 = vcombine.high %v2039_v35, %v2043_v37 }
 0x19d   : > { %1185 = vmatpush1.bf16.msra.mxu1 %v1662_v2  ;;  %v2556_v2 = vld [vmem:[#allocation40_spill] sm:$0xff] }
 0x19e   : > { %1144 = vmatpush1.bf16.msra.mxu0 %v1660_v60  ;;  %1186 = vmatprep.subr.bf16.mxu1 %v1667_v42  ;;  %v978_v60 = vpack.c.bf16 %v2309_v56, %v2309_v56  ;;  %v1691_v42 = vcombine.high %v2556_v2, %v2051_v41 }
 0x19f   : > { %1145 = vmatprep.subr.bf16.mxu0 %v1665_v48  ;;  %v1686_v48 = vcombine.low %v2039_v35, %v2043_v37 }
 0x1a1   : > { %1187 = vmatpush1.bf16.msra.mxu1 %v1666_v0  ;;  %v2558_v0 = vld [vmem:[#allocation41_spill] sm:$0xff] }
 0x1a2   : > { %1146 = vmatpush1.bf16.msra.mxu0 %v1664_v49  ;;  %1188 = vmatprep.subr.bf16.mxu1 %v1671_v1  ;;  %v1688_v49 = vcombine.low %v2041_v36, %v2045_v38 }
 0x1a3   : > { %1147 = vmatprep.subr.bf16.mxu0 %v1669_v62  ;;  %v2557_v62 = vld [vmem:[#allocation42_spill] sm:$0xff] }
 0x1a4   : > { %v1693_v1 = vcombine.high %v2558_v0, %v2557_v62 }
 0x1a5   : > { %1189 = vmatpush1.bf16.msra.mxu1 %v1670_v43  ;;  %v2560_v43 = vld [vmem:[#allocation43_spill] sm:$0xff] }
 0x1a6   : > { %1148 = vmatpush1.bf16.msra.mxu0 %v1668_v50  ;;  %1190 = vmatprep.subr.bf16.mxu1 %v1675_v44  ;;  %v1690_v50 = vcombine.low %v2556_v2, %v2051_v41  ;;  %v2574_v2 = vld [vmem:[#allocation56_spill] sm:$0xff] }
 0x1a7   : > { %1149 = vmatprep.subr.bf16.mxu0 %v1673_v52  ;;  %v2559_v52 = vld [vmem:[#allocation45_spill] sm:$0xff] }
 0x1a8   : > { %v1695_v44 = vcombine.high %v2560_v43, %v2559_v52 }
 0x1a9   : > { %1191 = vmatpush1.bf16.msra.mxu1 %v1674_v53  ;;  %v2562_v53 = vld [vmem:[#allocation44_spill] sm:$0xff] }
 0x1aa   : > { %1150 = vmatpush1.bf16.msra.mxu0 %v1672_v46  ;;  %1192 = vmatprep.subr.bf16.mxu1 %v1679_v61  ;;  %v1692_v46 = vcombine.low %v2558_v0, %v2557_v62 }
 0x1ab   : > { %1151 = vmatprep.subr.bf16.mxu0 %v1677_v58  ;;  %v2561_v58 = vld [vmem:[#allocation46_spill] sm:$0xff] }
 0x1ac   : > { %v1697_v61 = vcombine.high %v2562_v53, %v2561_v58 }
 0x1ad   : > { %1193 = vmatpush1.bf16.msra.mxu1 %v1678_v55  ;;  %v2564_v55 = vld [vmem:[#allocation47_spill] sm:$0xff] }
 0x1ae   : > { %1152 = vmatpush1.bf16.msra.mxu0 %v1676_v47  ;;  %1194 = vmatprep.subr.bf16.mxu1 %v1683_v63  ;;  %v1694_v47 = vcombine.low %v2560_v43, %v2559_v52 }
 0x1af   : > { %1153 = vmatprep.subr.bf16.mxu0 %v1681_v45  ;;  %v2563_v45 = vld [vmem:[#allocation49_spill] sm:$0xff] }
 0x1b0   : > { %v1699_v63 = vcombine.high %v2564_v55, %v2563_v45 }
 0x1b1   : > { %1195 = vmatpush1.bf16.msra.mxu1 %v1682_v40  ;;  %v2566_v40 = vld [vmem:[#allocation48_spill] sm:$0xff] }
 0x1b2   : > { %1154 = vmatpush1.bf16.msra.mxu0 %v1680_v59  ;;  %1436 = vmatprep.subr.bf16.mxu1 %v1689_v57  ;;  %v1696_v59 = vcombine.low %v2562_v53, %v2561_v58 }
 0x1b3   : > { %1395 = vmatprep.subr.bf16.mxu0 %v1687_v54  ;;  %v2565_v54 = vld [vmem:[#allocation50_spill] sm:$0xff] }
 0x1b4   : > { %1213 = vmatmul.mubr.bf16.vlgmr.msra.gmra.mrb[0].mxu1 %v978_v60  ;;  %v1701_v57 = vcombine.high %v2566_v40, %v2565_v54 }
 0x1b5   : > { %1172 = vmatmul.mubr.bf16.vlgmr.msra.gmra.mrb[0].mxu0 %v978_v60  ;;  %1437 = vmatpush1.bf16.msra.mxu1 %v1688_v49  ;;  %v2567_v60 = vld [vmem:[#allocation53_spill] sm:$0xff]  ;;  %v1700_v49 = vcombine.low %v2566_v40, %v2565_v54 }
 0x1b6   : > { %1396 = vmatpush1.bf16.msra.mxu0 %v1686_v48  ;;  %1438 = vmatprep.subr.bf16.mxu1 %v1693_v1  ;;  %v2568_v48 = vld [vmem:[#allocation51_spill] sm:$0xff]  ;;  %v2569_v1 = vld [vmem:[#allocation54_spill] sm:$0xff] }
 0x1b7   : > { %1397 = vmatprep.subr.bf16.mxu0 %v1691_v42  ;;  %1427 = vmatprep.mubr.bf16.mxu0 %v1899_v51  ;;  %v1703_v42 = vcombine.high %v2568_v48, %v2567_v60 }
 0x1b8   : > { %1468 = vmatprep.mubr.bf16.mxu1 %v1899_v51  ;;  %v1698_v51 = vcombine.low %v2564_v55, %v2563_v45 }
 0x1b9   : > { %1439 = vmatpush1.bf16.msra.mxu1 %v1692_v46  ;;  %v1702_v46 = vcombine.low %v2568_v48, %v2567_v60 }
 0x1ba   : > { %1398 = vmatpush1.bf16.msra.mxu0 %v1690_v50  ;;  %1440 = vmatprep.subr.bf16.mxu1 %v1697_v61  ;;  %v2570_v50 = vld [vmem:[#allocation52_spill] sm:$0xff]  ;;  %v2571_v61 = vld [vmem:[#allocation57_spill] sm:$0xff] }
 0x1bb   : > { %1399 = vmatprep.subr.bf16.mxu0 %v1695_v44  ;;  %v1705_v44 = vcombine.high %v2570_v50, %v2569_v1 }
 0x1bd   : > { %1441 = vmatpush1.bf16.msra.mxu1 %v1696_v59  ;;  %v2573_v59 = vld [vmem:[#allocation58_spill] sm:$0xff] }
 0x1be   : > { %1400 = vmatpush1.bf16.msra.mxu0 %v1694_v47  ;;  %1442 = vmatprep.subr.bf16.mxu1 %v1701_v57  ;;  %v2572_v47 = vld [vmem:[#allocation55_spill] sm:$0xff]  ;;  %v1709_v3 = vcombine.high %v2574_v2, %v2573_v59 }
 0x1bf   : > { %1401 = vmatprep.subr.bf16.mxu0 %v1699_v63  ;;  %v1707_v0 = vcombine.high %v2572_v47, %v2571_v61  ;;  %v1704_v63 = vcombine.low %v2570_v50, %v2569_v1  ;;  %v1706_v57 = vcombine.low %v2572_v47, %v2571_v61 }
 0x1c1   : > { %1443 = vmatpush1.bf16.msra.mxu1 %v1700_v49  ;;  %v2577_v49 = vld [vmem:[#allocation62_spill] sm:$0xff] }
 0x1c2   : > { %1402 = vmatpush1.bf16.msra.mxu0 %v1698_v51  ;;  %1444 = vmatprep.subr.bf16.mxu1 %v1705_v44  ;;  %v2575_v51 = vld [vmem:[#allocation61_spill] sm:$0xff]  ;;  %v1713_v1 = vcombine.high %v2578_v6, %v2577_v49 }
 0x1c3   : > { %1403 = vmatprep.subr.bf16.mxu0 %v1703_v42  ;;  %v1711_v5 = vcombine.high %v2576_v4, %v2575_v51  ;;  %v1708_v42 = vcombine.low %v2574_v2, %v2573_v59  ;;  %v1710_v44 = vcombine.low %v2576_v4, %v2575_v51  ;;  %v2582_v2 = vld [vmem:[#allocation64_spill] sm:$0xff] }
 0x1c5   : > { %1445 = vmatpush1.bf16.msra.mxu1 %v1704_v63  ;;  %v2581_v63 = vld [vmem:[#allocation66_spill] sm:$0xff] }
 0x1c6   : > { %1404 = vmatpush1.bf16.msra.mxu0 %v1702_v46  ;;  %1446 = vmatprep.subr.bf16.mxu1 %v1709_v3  ;;  %v2579_v46 = vld [vmem:[#allocation65_spill] sm:$0xff]  ;;  %v1717_v3 = vcombine.high %v2582_v2, %v2581_v63 }
 0x1c7   : > { %1405 = vmatprep.subr.bf16.mxu0 %v1707_v0  ;;  %v1715_v8 = vcombine.high %v2580_v7, %v2579_v46  ;;  %v1712_v0 = vcombine.low %v2578_v6, %v2577_v49 }
 0x1c9   : > { %1447 = vmatpush1.bf16.msra.mxu1 %v1708_v42  ;;  %v1234_v42 = vpack.c.bf16 %v2379_v9, %v2379_v9 }
 0x1ca   : > { %1406 = vmatpush1.bf16.msra.mxu0 %v1706_v57  ;;  %1448 = vmatprep.subr.bf16.mxu1 %v1713_v1  ;;  %v1714_v57 = vcombine.low %v2580_v7, %v2579_v46  ;;  %v974_v1 = vld [vmem:[%s973_s20] sm:$0xff] }
 0x1cb   : > { %1407 = vmatprep.subr.bf16.mxu0 %v1711_v5  ;;  %v1716_v5 = vcombine.low %v2582_v2, %v2581_v63 }
 0x1cd   : > { %1449 = vmatpush1.bf16.msra.mxu1 %v1712_v0 }
 0x1ce   : > { %1408 = vmatpush1.bf16.msra.mxu0 %v1710_v44  ;;  %1450 = vmatprep.subr.bf16.mxu1 %v1717_v3  ;;  %v975_v44 = vld [vmem:[%s973_s20 + $0x8] sm:$0xff] }
 0x1cf   : > { %1409 = vmatprep.subr.bf16.mxu0 %v1715_v8 }
 0x1d1   : > { %1451 = vmatpush1.bf16.msra.mxu1 %v1716_v5 }
 0x1d2   : > { %1410 = vmatpush1.bf16.msra.mxu0 %v1714_v57 }
 0x1d4   : > { %1469 = vmatmul.mubr.bf16.vlgmr.msra.gmra.mrb[4].mxu1 %v1234_v42 }
 0x1d5   : > { %1428 = vmatmul.mubr.bf16.vlgmr.msra.gmra.mrb[4].mxu0 %v1234_v42 }
 0x287   : > { %v1214_v6 = vpop.f32.mrb[0].mxu1 }
 0x288   : > { %v1173_v4 = vpop.f32.mrb[0].mxu0  ;;  %v1216_v3 = vpop.f32.mrb[1].mxu1  ;;  %v1223_v16 = vadd.f32 %v1214_v6, %v976_v14  ;;  %v1529_v14 = vstv %s1885_s16  ;;  %s958_s16 = sadd.s32 1, %s1885_s16  }
 0x289   : > { %v1221_v8 = vadd.f32 %v1173_v4, %v974_v1  ;;  %v1175_v0 = vpop.f32.mrb[1].mxu0  ;;  %v1218_v57 = vpop.f32.mrb[2].mxu1  ;;  %v1224_v13 = vadd.f32 %v1216_v3, %v977_v12  ;;  %v966_v12 = vld [vmem:[#allocation4] sm:$0xff]  ;;  %vm2395_vm0 = vcmp.lt.s32.totalorder %v1529_v14, %v2132_v39  ;;  %p957_p11 = scmp.ge.s32.totalorder %s958_s16, %s2427_s0 }
 0x28a   : > { %v1222_v7 = vadd.f32 %v1175_v0, %v975_v44  ;;  %v1177_v2 = vpop.f32.mrb[2].mxu0  ;;  %v1219_v42 = vpop.f32.mrb[3].mxu1  ;;  %v1230_v0 = vld [vmem:[%s1229_s27 + $0x20] sm:$0xff]  ;;  %v1231_v3 = vld [vmem:[%s1229_s27 + $0x28] sm:$0xff] }
 0x28b   : > { %v1718_v10 = vmul.f32 -1.442695, %v1221_v8  ;;  %v1178_v11 = vpop.f32.mrb[3].mxu0  ;;  %v1720_v15 = vmul.f32 -1.442695, %v1224_v13 }
 0x28c   : > { %v1719_v5 = vmul.f32 -1.442695, %v1222_v7 }
 0x28d   : > { %1753 = vpow2.f32 %v1718_v10 }
 0x28e   : > { %1755 = vpow2.f32 %v1719_v5 }
 0x28f   : > { %1757 = vpow2.f32 %v1720_v15 }
 0x290   : > { %1759 = vtanh.f32 %v1223_v16 }
 0x297   : > { %v1754_v4 = vpop.eup %1753 }
 0x298   : > { %v1756_v11 = vpop.eup %1755  ;;  %v1484_v7 = vadd.f32 1.0, %v1754_v4 }
 0x299   : > { %v1490_v2 = vadd.f32 1.0, %v1756_v11  ;;  %v1758_v6 = vpop.eup %1757 }
 0x29a   : > { %1761 = vrcp.f32 %v1484_v7  ;;  %v1760_v10 = vpop.eup %1759  ;;  %v1497_v1 = vadd.f32 1.0, %v1758_v6 }
 0x29b   : > { %1763 = vrcp.f32 %v1490_v2 }
 0x29c   : > { %1765 = vrcp.f32 %v1497_v1 }
 0x2a4   : > { %v1762_v13 = vpop.eup %1761 }
 0x2a5   : > { %v1764_v44 = vpop.eup %1763  ;;  %v1501_v15 = vmul.f32 %v1762_v13, %v1760_v10 }
 0x2a6   : > { %v1500_v8 = vmul.f32 %v1764_v44, %v966_v12 }
 0x2a7   : > { %v1470_v11 = vpop.f32.mrb[4].mxu1 }
 0x2a8   : > { %v1502_v57 = vadd.f32 %v1501_v15, %v1500_v8  ;;  %v1429_v5 = vpop.f32.mrb[4].mxu0  ;;  %v1472_v10 = vpop.f32.mrb[5].mxu1  ;;  %v1232_v15 = vld [vmem:[%s1229_s27 + $0x30] sm:$0xff] }
 0x2a9   : > { %v1477_v42 = vadd.f32 %v1429_v5, %v1230_v0  ;;  %v1431_v4 = vpop.f32.mrb[5].mxu0  ;;  %v1474_v44 = vpop.f32.mrb[6].mxu1  ;;  %v1480_v1 = vadd.f32 %v1472_v10, %v1233_v18  ;;  %v1479_v20 = vadd.f32 %v1470_v11, %v1232_v15  ;;  %v1531_v10 = vstv %s2390_s23 }
 0x2aa   : > { %1767 = vtanh.f32 %v1502_v57  ;;  %v1543_v7 = vsel %vm2395_vm0, %v1502_v57, %v966_v12  ;;  %v1478_v2 = vadd.f32 %v1431_v4, %v1231_v3  ;;  %v1433_v6 = vpop.f32.mrb[6].mxu0  ;;  %v1475_v19 = vpop.f32.mrb[7].mxu1  ;;  %v1535_v12 = vld [vmem:[#allocation7] sm:$0xff]  ;;  %vm1532_vm1 = vcmp.lt.s32.totalorder %v1531_v10, %v2132_v39 }
 0x2ab   : > { %1544 = vst [vmem:[#allocation4] sm:$0xff] %v1543_v7  ;;  %v1721_v13 = vmul.f32 -1.442695, %v1477_v42  ;;  %v1434_v14 = vpop.f32.mrb[7].mxu0  ;;  %v1766_v8 = vpop.eup %1765  ;;  %v1723_v0 = vmul.f32 -1.442695, %v1480_v1 }
 0x2ac   : > { %v1722_v17 = vmul.f32 -1.442695, %v1478_v2  ;;  %v968_v2 = vld [vmem:[#allocation6] sm:$0xff] }
 0x2ad   : > { %1769 = vpow2.f32 %v1721_v13 }
 0x2ae   : > { %1771 = vpow2.f32 %v1722_v17 }
 0x2af   : > { %1773 = vpow2.f32 %v1723_v0 }
 0x2b0   : > { %1775 = vtanh.f32 %v1479_v20 }
 0x2b4   : > { %v1768_v5 = vpop.eup %1767 }
 0x2b5   : > { %v1504_v21 = vmul.f32 %v1768_v5, %v1766_v8  ;;  %v1538_v8 = vld [vmem:[#allocation8] sm:$0xff] }
 0x2b7   : > { %v1770_v3 = vpop.eup %1769  ;;  %v1533_v57 = vsel %vm2395_vm0, %v1504_v21, 0.0  ;;  %v1541_v42 = vsel %vm2395_vm0, %v1504_v21, %v2309_v56 }
 0x2b8   : > { %v1772_v19 = vpop.eup %1771  ;;  %v1536_v17 = vmax.f32 %v1535_v12, %v1533_v57  ;;  %1542 = vst [vmem:[#allocation3] sm:$0xff] %v1541_v42  ;;  %v1508_v18 = vadd.f32 1.0, %v1770_v3 }
 0x2b9   : > { %v1514_v4 = vadd.f32 1.0, %v1772_v19  ;;  %v1774_v11 = vpop.eup %1773 }
 0x2ba   : > { %1537 = vst [vmem:[#allocation7] sm:$0xff] %v1536_v17  ;;  %1777 = vrcp.f32 %v1508_v18  ;;  %v1776_v7 = vpop.eup %1775  ;;  %v1521_v13 = vadd.f32 1.0, %v1774_v11 }
 0x2bb   : > { %1779 = vrcp.f32 %v1514_v4 }
 0x2bc   : > { %1781 = vrcp.f32 %v1521_v13 }
 0x2c4   : > { %v1778_v6 = vpop.eup %1777 }
 0x2c5   : > { %v1780_v14 = vpop.eup %1779  ;;  %v1525_v16 = vmul.f32 %v1778_v6, %v1776_v7 }
 0x2c6   : > { %v1524_v44 = vmul.f32 %v1780_v14, %v968_v2  ;;  %v1782_v20 = vpop.eup %1781 }
 0x2c8   : > { %v1526_v21 = vadd.f32 %v1525_v16, %v1524_v44 }
 0x2ca   : > { %1783 = vtanh.f32 %v1526_v21  ;;  %v1547_v56 = vsel %vm1532_vm1, %v1526_v21, %v968_v2 }
 0x2cb   : > { %1548 = vst [vmem:[#allocation6] sm:$0xff] %v1547_v56 }
 0x2d4   : > { %v1784_v1 = vpop.eup %1783  ;;  %960 = sbr.rel (!%p957_p11) target bundleno = 396 (0x18c), region = 62 }
 0x2d5   : > { %v1528_v15 = vmul.f32 %v1784_v1, %v1782_v20 }
 0x2d7   : > { %v1534_v0 = vsel %vm1532_vm1, %v1528_v15, 0.0  ;;  %v1545_v5 = vsel %vm1532_vm1, %v1528_v15, %v2379_v9 }
 0x2d8   : > { %v1539_v12 = vmax.f32 %v1538_v8, %v1534_v0  ;;  %1546 = vst [vmem:[#allocation5] sm:$0xff] %v1545_v5 }
 0x2da   : > { %1540 = vst [vmem:[#allocation8] sm:$0xff] %v1539_v12 }
 0x2db PF:  { %v1549_v3 = vld [vmem:[#allocation7] sm:$0xff]  ;;  %s1900_s30 = smov [#allocation17]  }
 0x2dc   :  { %1550 = vst [vmem:[#allocation17] sm:$0xff] %v1549_v3  ;;  %s1559_s7 = sshll.u32 %s1900_s30, 4  ;;  %s1560_s7 = int_to_ptr.vmem [resolvable:$true] %s1559_s7 }
 0x2dd   :  { %s1851_s8 = scalar_lea.vmem %s1560_s7, 256  ;;  %p1856_p13 = scmp.lt.s32.totalorder %s1560_s7, %s1560_s7 }
 0x2de   :  { %p1852_p12 = scmp.ne.s32.totalorder %s1560_s7, %s1851_s8  ;;  %p1857_p0 = scmp.lt.s32.totalorder %s1851_s8, %s1851_s8 }
 0x2e0   :  { %p1858_p1 = por %p1857_p0, %p1856_p13 }
 0x2e1   :  { %v1551_v57 = vld [vmem:[#allocation8] sm:$0xff] }
 0x2e2   :  { %1552 = vst [vmem:[#allocation17 + $0x8] sm:$0xff] %v1551_v57  ;;  %p1859_p2 = pnand %p1858_p1, %p1852_p12 }
 0x2e4   :  { %1862 = shalt.err (!%p1859_p2)
}
 0x2e5   :  { %s1863_s10 = scalar_lea.hbm %s2433_s6, 256 }
 0x2e6   :  { %p1864_p3 = scmp.ne.s32.totalorder %s2433_s6, %s1863_s10  ;;  %p1867_p4 = scmp.lt.u32.totalorder %s1863_s10, %s2433_s6 }
 0x2e8   :  { %p1869_p5 = pnand %p1867_p4, %p1864_p3 }
 0x2ea   :  { %1872 = shalt.err (!%p1869_p5)
}
 0x2eb   :  { %1562 = dma.vmem_to_hbm [thread:$0]  %s1560_s7, 256, %s2433_s6, [#allocation13]  }
 0x2ec   :  { %1881 = dma.done.wait [#allocation13], 256  }
 0x2ed   :  { %1882 = vsyncadd [#allocation13], 4294967040 }
 0x2ee   :  { %1566 = vsyncpa [#allocation12], 1 }
 0x2ef   :  { %1567 = vsyncpa [#allocation15], 1 }
 0x2f0   :  { %1568 = vsyncpa [#allocation13], 1 }

</bundles_post_ra>
